<compile_context>
chip_gen: v6e
topology: v6e:2x2x1
jax: 0.10.0
libtpu: 0.0.40
codegen_flags: <defaults>
</compile_context>

<pallas_src>
import jax
import jax.numpy as jnp
from jax.experimental import pallas as pl
from jax.experimental.pallas import tpu as pltpu  # noqa: F401  (kept for parity / future scratch use)


# -----------------------------------------------------------------------------
# Fused RVAE kernel
# -----------------------------------------------------------------------------
def _rvae_kernel(x_ref, wih_enc_ref, whh_enc_ref, b_enc_ref,
                 wz_ref, bz_ref, noise_ref,
                 wih_dec_ref, whh_dec_ref, b_dec_ref,
                 wo_ref, bo_ref,
                 out_ref, mean_ref, logvar_ref):
    """Fused RVAE forward (grid-less, everything VMEM-resident).

    x_ref       : (T*Bp, L)  time-major encoder input, flattened over (T, Bp)
    wih_enc_ref : (L, 4H)    encoder input weight  (gate order i|f|o|g, g x2)
    whh_enc_ref : (H, 4H)    encoder recurrent weight (same layout)
    b_enc_ref   : (1, 4H)    combined encoder bias (b_ih + b_hh, g x2)
    wz_ref      : (H, 2L)    fused z_mean | z_var weight
    bz_ref      : (1, 2L)
    noise_ref   : (Bp, L)    reparameterization noise
    wih_dec_ref : (L, 4H)    decoder input weight
    whh_dec_ref : (H, 4H)    decoder recurrent weight
    b_dec_ref   : (1, 4H)
    wo_ref      : (H, O)     output linear weight
    bo_ref      : (1, O)
    out_ref     : (T*Bp, O)  decoder outputs (time-major, flattened)
    mean_ref    : (Bp, L)
    logvar_ref  : (Bp, L)
    """
    H = whh_enc_ref.shape[0]
    Bp, L = noise_ref.shape
    T = x_ref.shape[0] // Bp

    # Hoist recurrent weights (constant across steps) out of the loops.
    whh_enc = whh_enc_ref[...]
    whh_dec = whh_dec_ref[...]

    def lstm_cell(pre, h, c, whh):
        # pre already contains x_t @ W_ih + b (g-gate columns pre-scaled x2).
        gates = pre + jnp.dot(h, whh, preferred_element_type=jnp.float32)
        # Single full-vreg EUP pass: sigmoid over all (Bp, 4H) = (8, 128).
        s = jax.nn.sigmoid(gates)
        i_g = s[:, 0 * H:1 * H]
        f_g = s[:, 1 * H:2 * H]
        o_g = s[:, 2 * H:3 * H]
        g_g = 2.0 * s[:, 3 * H:4 * H] - 1.0     # tanh(a) = 2*sigmoid(2a) - 1
        c_new = f_g * c + i_g * g_g
        h_new = o_g * jnp.tanh(c_new)
        return h_new, c_new

    # ---------------- encoder ------------------------------------------------
    # All T input projections in one MXU call, bias folded in.
    x_proj = (jnp.dot(x_ref[...], wih_enc_ref[...],
                      preferred_element_type=jnp.float32) + b_enc_ref[...])

    h = jnp.zeros((Bp, H), jnp.float32)
    c = jnp.zeros((Bp, H), jnp.float32)
    for t in range(T):                           # static unroll, static slices
        h, c = lstm_cell(x_proj[t * Bp:(t + 1) * Bp], h, c, whh_enc)

    # ReLU'd last encoder output -> fused z_mean|z_var head -> reparameterize.
    enc_last = jnp.maximum(h, 0.0)
    mv = (jnp.dot(enc_last, wz_ref[...], preferred_element_type=jnp.float32)
          + bz_ref[...])
    mean = mv[:, :L]
    logvar = mv[:, L:]
    mean_ref[...] = mean
    logvar_ref[...] = logvar
    z = noise_ref[...] * jnp.exp(0.5 * logvar) + mean

    # ---------------- decoder ------------------------------------------------
    # z is constant over time: project it once (bias folded in).
    z_proj = (jnp.dot(z, wih_dec_ref[...], preferred_element_type=jnp.float32)
              + b_dec_ref[...])

    h = jnp.zeros((Bp, H), jnp.float32)
    c = jnp.zeros((Bp, H), jnp.float32)
    h_steps = []
    for t in range(T):
        h, c = lstm_cell(z_proj, h, c, whh_dec)
        h_steps.append(h)

    # Output linear hoisted out of the loop: one ReLU, one matmul, one store.
    h_stack = jnp.concatenate(h_steps, axis=0)           # (T*Bp, H)
    h_relu = jnp.maximum(h_stack, 0.0)
    out_ref[...] = (jnp.dot(h_relu, wo_ref[...],
                            preferred_element_type=jnp.float32) + bo_ref[...])


def _full_spec(shape):
    # Whole-array VMEM block; no grid, so the index map takes no grid indices.
    return pl.BlockSpec(shape, lambda *_: (0,) * len(shape))


def rvae_pallas_call(x2d, noise, params):
    TB = x2d.shape[0]
    Bp, L = noise.shape
    O = params["out_w"].shape[1]

    args = (x2d,
            params["enc_wih"], params["enc_whh"], params["enc_b"],
            params["z_w"], params["z_b"], noise,
            params["dec_wih"], params["dec_whh"], params["dec_b"],
            params["out_w"], params["out_b"])

    return pl.pallas_call(
        _rvae_kernel,
        out_shape=(
            jax.ShapeDtypeStruct((TB, O), jnp.float32),
            jax.ShapeDtypeStruct((Bp, L), jnp.float32),
            jax.ShapeDtypeStruct((Bp, L), jnp.float32),
        ),
        in_specs=[_full_spec(a.shape) for a in args],
        out_specs=(
            _full_spec((TB, O)),
            _full_spec((Bp, L)),
            _full_spec((Bp, L)),
        ),
    )(*args)


# -----------------------------------------------------------------------------
# Parameter init (deterministic, PyTorch-style uniform bounds, kernel layouts)
# -----------------------------------------------------------------------------
def _uniform(key, shape, bound):
    return jax.random.uniform(key, shape, jnp.float32, -bound, bound)


def init_rvae_params(key, input_size, hidden_size, latent_size, output_size):
    # TODO(synk): reference module never sets self.num_layers; 1 layer is used.
    ks = jax.random.split(key, 14)
    H = hidden_size
    bound = 1.0 / float(H) ** 0.5

    # Gate columns laid out i|f|o|g (PyTorch uses i|f|g|o) and the g block is
    # pre-scaled by 2 so the kernel can run a single full-vreg sigmoid and
    # recover tanh(a) = 2*sigmoid(2a) - 1.  Weights are freshly initialized in
    # this layout; porting trained PyTorch weights would require permuting the
    # g/o blocks and applying the x2 scaling.
    g_scale = jnp.concatenate(
        [jnp.ones((3 * H,), jnp.float32), jnp.full((H,), 2.0, jnp.float32)])

    def lstm_params(kw_ih, kw_hh, kb_ih, kb_hh, in_f):
        w_ih = _uniform(kw_ih, (in_f, 4 * H), bound) * g_scale
        w_hh = _uniform(kw_hh, (H, 4 * H), bound) * g_scale
        b = (_uniform(kb_ih, (1, 4 * H), bound)
             + _uniform(kb_hh, (1, 4 * H), bound)) * g_scale
        return w_ih, w_hh, b

    enc_wih, enc_whh, enc_b = lstm_params(ks[0], ks[1], ks[2], ks[3],
                                          latent_size)
    dec_wih, dec_whh, dec_b = lstm_params(ks[4], ks[5], ks[6], ks[7],
                                          latent_size)

    # Fused z_mean | z_var head: (H, 2L), bias (1, 2L).
    z_w = jnp.concatenate(
        [_uniform(ks[8], (H, latent_size), bound),
         _uniform(ks[9], (H, latent_size), bound)], axis=1)
    z_b = jnp.concatenate(
        [_uniform(ks[10], (1, latent_size), bound),
         _uniform(ks[11], (1, latent_size), bound)], axis=1)

    out_w = _uniform(ks[12], (H, output_size), bound)
    out_b = _uniform(ks[13], (1, output_size), bound)

    return dict(enc_wih=enc_wih, enc_whh=enc_whh, enc_b=enc_b,
                dec_wih=dec_wih, dec_whh=dec_whh, dec_b=dec_b,
                z_w=z_w, z_b=z_b, out_w=out_w, out_b=out_b)


# -----------------------------------------------------------------------------
# RVAE forward
# -----------------------------------------------------------------------------
@jax.jit
def rvae_forward(params, x, noise):
    """x: (B, T, latent_size) batch_first float32; noise: (B, latent_size).

    Returns (out, mean, logvar):
      out    : (B, T, output_size)
      mean   : (B, latent_size)
      logvar : (B, latent_size)
    """
    B, T, L = x.shape
    Bp = ((B + 7) // 8) * 8                      # pad batch to 8 sublanes

    x_tbf = jnp.transpose(x, (1, 0, 2))          # (T, B, L) time-major
    x_tbf = jnp.pad(x_tbf, ((0, 0), (0, Bp - B), (0, 0)))
    x2d = x_tbf.reshape(T * Bp, L)               # lane-dense 2-D slab
    noise_p = jnp.pad(noise, ((0, Bp - B), (0, 0)))

    out2d, mean_p, logvar_p = rvae_pallas_call(x2d, noise_p, params)

    out = out2d.reshape(T, Bp, -1).transpose(1, 0, 2)[:B]   # (B, T, O)
    return out, mean_p[:B], logvar_p[:B]


# -----------------------------------------------------------------------------
# Main
# -----------------------------------------------------------------------------
if __name__ == "__main__":
    INPUT_SIZE = 8    # unused by the encoder LSTM in the reference code
    HIDDEN = 32
    LATENT = 8
    OUTPUT = 8
    B, T = 2, 8

    key = jax.random.PRNGKey(0)
    k_param, k_x, k_noise = jax.random.split(key, 3)

    params = init_rvae_params(k_param, INPUT_SIZE, HIDDEN, LATENT, OUTPUT)

    # Encoder LSTM was declared with input size = latent_size in the reference.
    x = jax.random.normal(k_x, (B, T, LATENT), jnp.float32)
    noise = jax.random.normal(k_noise, (B, LATENT), jnp.float32)

    out, mean, logvar = rvae_forward(params, x, noise)
    jax.block_until_ready((out, mean, logvar))

    assert out.shape == (B, T, OUTPUT)
    assert mean.shape == (B, LATENT)
    assert logvar.shape == (B, LATENT)
    assert bool(jnp.all(jnp.isfinite(out)))
    assert bool(jnp.all(jnp.isfinite(mean)))
    assert bool(jnp.all(jnp.isfinite(logvar)))
    print("KERNEL_OK")
</pallas_src>

<mosaic_0001>
module attributes {stable_mosaic.version = 11 : i64} {
  func.func @_rvae_kernel(%arg0: memref<64x8xf32, #tpu.memory_space<vmem>>, %arg1: memref<8x128xf32, #tpu.memory_space<vmem>>, %arg2: memref<32x128xf32, #tpu.memory_space<vmem>>, %arg3: memref<1x128xf32, #tpu.memory_space<vmem>>, %arg4: memref<32x16xf32, #tpu.memory_space<vmem>>, %arg5: memref<1x16xf32, #tpu.memory_space<vmem>>, %arg6: memref<8x8xf32, #tpu.memory_space<vmem>>, %arg7: memref<8x128xf32, #tpu.memory_space<vmem>>, %arg8: memref<32x128xf32, #tpu.memory_space<vmem>>, %arg9: memref<1x128xf32, #tpu.memory_space<vmem>>, %arg10: memref<32x8xf32, #tpu.memory_space<vmem>>, %arg11: memref<1x8xf32, #tpu.memory_space<vmem>>, %arg12: memref<64x8xf32, #tpu.memory_space<vmem>>, %arg13: memref<8x8xf32, #tpu.memory_space<vmem>>, %arg14: memref<8x8xf32, #tpu.memory_space<vmem>>) attributes {dimension_semantics = [], scalar_prefetch = 0 : i64, scratch_operands = 0 : i64, tpu.core_type = #tpu.core_type<tc>} {
    %c0 = arith.constant 0 : index
    %c0_0 = arith.constant 0 : index
    %0 = vector.load %arg2[%c0, %c0_0] : memref<32x128xf32, #tpu.memory_space<vmem>>, vector<32x128xf32>
    %c0_1 = arith.constant 0 : index
    %c0_2 = arith.constant 0 : index
    %1 = vector.load %arg8[%c0_1, %c0_2] : memref<32x128xf32, #tpu.memory_space<vmem>>, vector<32x128xf32>
    %c0_3 = arith.constant 0 : index
    %c0_4 = arith.constant 0 : index
    %2 = vector.load %arg0[%c0_3, %c0_4] : memref<64x8xf32, #tpu.memory_space<vmem>>, vector<64x8xf32>
    %c0_5 = arith.constant 0 : index
    %c0_6 = arith.constant 0 : index
    %3 = vector.load %arg1[%c0_5, %c0_6] : memref<8x128xf32, #tpu.memory_space<vmem>>, vector<8x128xf32>
    %cst = arith.constant dense<0.000000e+00> : vector<64x128xf32>
    %4 = tpu.matmul %2, %3, %cst {dimension_numbers = #tpu.dot_dimension_numbers<[1], [0], [0], [1], [0, 0, 1, 1], [], []>} : vector<64x8xf32>, vector<8x128xf32>, vector<64x128xf32> -> vector<64x128xf32>
    %c0_7 = arith.constant 0 : index
    %c0_8 = arith.constant 0 : index
    %5 = vector.load %arg3[%c0_7, %c0_8] : memref<1x128xf32, #tpu.memory_space<vmem>>, vector<1x128xf32>
    %6 = vector.broadcast %5 : vector<1x128xf32> to vector<64x128xf32>
    %7 = arith.addf %4, %6 : vector<64x128xf32>
    %cst_9 = arith.constant 0.000000e+00 : f32
    %8 = vector.broadcast %cst_9 : f32 to vector<8x32xf32>
    %cst_10 = arith.constant 0.000000e+00 : f32
    %9 = vector.broadcast %cst_10 : f32 to vector<8x32xf32>
    %10 = vector.extract_strided_slice %7 {offsets = [0, 0], sizes = [8, 128], strides = [1, 1]} : vector<64x128xf32> to vector<8x128xf32>
    %cst_11 = arith.constant dense<0.000000e+00> : vector<8x128xf32>
    %11 = tpu.matmul %8, %0, %cst_11 {dimension_numbers = #tpu.dot_dimension_numbers<[1], [0], [0], [1], [0, 0, 1, 1], [], []>} : vector<8x32xf32>, vector<32x128xf32>, vector<8x128xf32> -> vector<8x128xf32>
    %12 = arith.addf %10, %11 : vector<8x128xf32>
    %13 = arith.negf %12 : vector<8x128xf32>
    %14 = math.exp %13 : vector<8x128xf32>
    %cst_12 = arith.constant 1.000000e+00 : f32
    %15 = vector.broadcast %cst_12 : f32 to vector<8x128xf32>
    %16 = arith.addf %15, %14 : vector<8x128xf32>
    %17 = arith.divf %15, %16 : vector<8x128xf32>
    %18 = vector.extract_strided_slice %17 {offsets = [0, 0], sizes = [8, 32], strides = [1, 1]} : vector<8x128xf32> to vector<8x32xf32>
    %19 = vector.extract_strided_slice %17 {offsets = [0, 32], sizes = [8, 32], strides = [1, 1]} : vector<8x128xf32> to vector<8x32xf32>
    %20 = vector.extract_strided_slice %17 {offsets = [0, 64], sizes = [8, 32], strides = [1, 1]} : vector<8x128xf32> to vector<8x32xf32>
    %21 = vector.extract_strided_slice %17 {offsets = [0, 96], sizes = [8, 32], strides = [1, 1]} : vector<8x128xf32> to vector<8x32xf32>
    %cst_13 = arith.constant 2.000000e+00 : f32
    %22 = vector.broadcast %cst_13 : f32 to vector<8x32xf32>
    %23 = arith.mulf %22, %21 : vector<8x32xf32>
    %cst_14 = arith.constant 1.000000e+00 : f32
    %24 = vector.broadcast %cst_14 : f32 to vector<8x32xf32>
    %25 = arith.subf %23, %24 : vector<8x32xf32>
    %26 = arith.mulf %19, %9 : vector<8x32xf32>
    %27 = arith.mulf %18, %25 : vector<8x32xf32>
    %28 = arith.addf %26, %27 : vector<8x32xf32>
    %29 = math.tanh %28 : vector<8x32xf32>
    %30 = arith.mulf %20, %29 : vector<8x32xf32>
    %31 = vector.extract_strided_slice %7 {offsets = [8, 0], sizes = [8, 128], strides = [1, 1]} : vector<64x128xf32> to vector<8x128xf32>
    %cst_15 = arith.constant dense<0.000000e+00> : vector<8x128xf32>
    %32 = tpu.matmul %30, %0, %cst_15 {dimension_numbers = #tpu.dot_dimension_numbers<[1], [0], [0], [1], [0, 0, 1, 1], [], []>} : vector<8x32xf32>, vector<32x128xf32>, vector<8x128xf32> -> vector<8x128xf32>
    %33 = arith.addf %31, %32 : vector<8x128xf32>
    %34 = arith.negf %33 : vector<8x128xf32>
    %35 = math.exp %34 : vector<8x128xf32>
    %cst_16 = arith.constant 1.000000e+00 : f32
    %36 = vector.broadcast %cst_16 : f32 to vector<8x128xf32>
    %37 = arith.addf %36, %35 : vector<8x128xf32>
    %38 = arith.divf %36, %37 : vector<8x128xf32>
    %39 = vector.extract_strided_slice %38 {offsets = [0, 0], sizes = [8, 32], strides = [1, 1]} : vector<8x128xf32> to vector<8x32xf32>
    %40 = vector.extract_strided_slice %38 {offsets = [0, 32], sizes = [8, 32], strides = [1, 1]} : vector<8x128xf32> to vector<8x32xf32>
    %41 = vector.extract_strided_slice %38 {offsets = [0, 64], sizes = [8, 32], strides = [1, 1]} : vector<8x128xf32> to vector<8x32xf32>
    %42 = vector.extract_strided_slice %38 {offsets = [0, 96], sizes = [8, 32], strides = [1, 1]} : vector<8x128xf32> to vector<8x32xf32>
    %cst_17 = arith.constant 2.000000e+00 : f32
    %43 = vector.broadcast %cst_17 : f32 to vector<8x32xf32>
    %44 = arith.mulf %43, %42 : vector<8x32xf32>
    %cst_18 = arith.constant 1.000000e+00 : f32
    %45 = vector.broadcast %cst_18 : f32 to vector<8x32xf32>
    %46 = arith.subf %44, %45 : vector<8x32xf32>
    %47 = arith.mulf %40, %28 : vector<8x32xf32>
    %48 = arith.mulf %39, %46 : vector<8x32xf32>
    %49 = arith.addf %47, %48 : vector<8x32xf32>
    %50 = math.tanh %49 : vector<8x32xf32>
    %51 = arith.mulf %41, %50 : vector<8x32xf32>
    %52 = vector.extract_strided_slice %7 {offsets = [16, 0], sizes = [8, 128], strides = [1, 1]} : vector<64x128xf32> to vector<8x128xf32>
    %cst_19 = arith.constant dense<0.000000e+00> : vector<8x128xf32>
    %53 = tpu.matmul %51, %0, %cst_19 {dimension_numbers = #tpu.dot_dimension_numbers<[1], [0], [0], [1], [0, 0, 1, 1], [], []>} : vector<8x32xf32>, vector<32x128xf32>, vector<8x128xf32> -> vector<8x128xf32>
    %54 = arith.addf %52, %53 : vector<8x128xf32>
    %55 = arith.negf %54 : vector<8x128xf32>
    %56 = math.exp %55 : vector<8x128xf32>
    %cst_20 = arith.constant 1.000000e+00 : f32
    %57 = vector.broadcast %cst_20 : f32 to vector<8x128xf32>
    %58 = arith.addf %57, %56 : vector<8x128xf32>
    %59 = arith.divf %57, %58 : vector<8x128xf32>
    %60 = vector.extract_strided_slice %59 {offsets = [0, 0], sizes = [8, 32], strides = [1, 1]} : vector<8x128xf32> to vector<8x32xf32>
    %61 = vector.extract_strided_slice %59 {offsets = [0, 32], sizes = [8, 32], strides = [1, 1]} : vector<8x128xf32> to vector<8x32xf32>
    %62 = vector.extract_strided_slice %59 {offsets = [0, 64], sizes = [8, 32], strides = [1, 1]} : vector<8x128xf32> to vector<8x32xf32>
    %63 = vector.extract_strided_slice %59 {offsets = [0, 96], sizes = [8, 32], strides = [1, 1]} : vector<8x128xf32> to vector<8x32xf32>
    %cst_21 = arith.constant 2.000000e+00 : f32
    %64 = vector.broadcast %cst_21 : f32 to vector<8x32xf32>
    %65 = arith.mulf %64, %63 : vector<8x32xf32>
    %cst_22 = arith.constant 1.000000e+00 : f32
    %66 = vector.broadcast %cst_22 : f32 to vector<8x32xf32>
    %67 = arith.subf %65, %66 : vector<8x32xf32>
    %68 = arith.mulf %61, %49 : vector<8x32xf32>
    %69 = arith.mulf %60, %67 : vector<8x32xf32>
    %70 = arith.addf %68, %69 : vector<8x32xf32>
    %71 = math.tanh %70 : vector<8x32xf32>
    %72 = arith.mulf %62, %71 : vector<8x32xf32>
    %73 = vector.extract_strided_slice %7 {offsets = [24, 0], sizes = [8, 128], strides = [1, 1]} : vector<64x128xf32> to vector<8x128xf32>
    %cst_23 = arith.constant dense<0.000000e+00> : vector<8x128xf32>
    %74 = tpu.matmul %72, %0, %cst_23 {dimension_numbers = #tpu.dot_dimension_numbers<[1], [0], [0], [1], [0, 0, 1, 1], [], []>} : vector<8x32xf32>, vector<32x128xf32>, vector<8x128xf32> -> vector<8x128xf32>
    %75 = arith.addf %73, %74 : vector<8x128xf32>
    %76 = arith.negf %75 : vector<8x128xf32>
    %77 = math.exp %76 : vector<8x128xf32>
    %cst_24 = arith.constant 1.000000e+00 : f32
    %78 = vector.broadcast %cst_24 : f32 to vector<8x128xf32>
    %79 = arith.addf %78, %77 : vector<8x128xf32>
    %80 = arith.divf %78, %79 : vector<8x128xf32>
    %81 = vector.extract_strided_slice %80 {offsets = [0, 0], sizes = [8, 32], strides = [1, 1]} : vector<8x128xf32> to vector<8x32xf32>
    %82 = vector.extract_strided_slice %80 {offsets = [0, 32], sizes = [8, 32], strides = [1, 1]} : vector<8x128xf32> to vector<8x32xf32>
    %83 = vector.extract_strided_slice %80 {offsets = [0, 64], sizes = [8, 32], strides = [1, 1]} : vector<8x128xf32> to vector<8x32xf32>
    %84 = vector.extract_strided_slice %80 {offsets = [0, 96], sizes = [8, 32], strides = [1, 1]} : vector<8x128xf32> to vector<8x32xf32>
    %cst_25 = arith.constant 2.000000e+00 : f32
    %85 = vector.broadcast %cst_25 : f32 to vector<8x32xf32>
    %86 = arith.mulf %85, %84 : vector<8x32xf32>
    %cst_26 = arith.constant 1.000000e+00 : f32
    %87 = vector.broadcast %cst_26 : f32 to vector<8x32xf32>
    %88 = arith.subf %86, %87 : vector<8x32xf32>
    %89 = arith.mulf %82, %70 : vector<8x32xf32>
    %90 = arith.mulf %81, %88 : vector<8x32xf32>
    %91 = arith.addf %89, %90 : vector<8x32xf32>
    %92 = math.tanh %91 : vector<8x32xf32>
    %93 = arith.mulf %83, %92 : vector<8x32xf32>
    %94 = vector.extract_strided_slice %7 {offsets = [32, 0], sizes = [8, 128], strides = [1, 1]} : vector<64x128xf32> to vector<8x128xf32>
    %cst_27 = arith.constant dense<0.000000e+00> : vector<8x128xf32>
    %95 = tpu.matmul %93, %0, %cst_27 {dimension_numbers = #tpu.dot_dimension_numbers<[1], [0], [0], [1], [0, 0, 1, 1], [], []>} : vector<8x32xf32>, vector<32x128xf32>, vector<8x128xf32> -> vector<8x128xf32>
    %96 = arith.addf %94, %95 : vector<8x128xf32>
    %97 = arith.negf %96 : vector<8x128xf32>
    %98 = math.exp %97 : vector<8x128xf32>
    %cst_28 = arith.constant 1.000000e+00 : f32
    %99 = vector.broadcast %cst_28 : f32 to vector<8x128xf32>
    %100 = arith.addf %99, %98 : vector<8x128xf32>
    %101 = arith.divf %99, %100 : vector<8x128xf32>
    %102 = vector.extract_strided_slice %101 {offsets = [0, 0], sizes = [8, 32], strides = [1, 1]} : vector<8x128xf32> to vector<8x32xf32>
    %103 = vector.extract_strided_slice %101 {offsets = [0, 32], sizes = [8, 32], strides = [1, 1]} : vector<8x128xf32> to vector<8x32xf32>
    %104 = vector.extract_strided_slice %101 {offsets = [0, 64], sizes = [8, 32], strides = [1, 1]} : vector<8x128xf32> to vector<8x32xf32>
    %105 = vector.extract_strided_slice %101 {offsets = [0, 96], sizes = [8, 32], strides = [1, 1]} : vector<8x128xf32> to vector<8x32xf32>
    %cst_29 = arith.constant 2.000000e+00 : f32
    %106 = vector.broadcast %cst_29 : f32 to vector<8x32xf32>
    %107 = arith.mulf %106, %105 : vector<8x32xf32>
    %cst_30 = arith.constant 1.000000e+00 : f32
    %108 = vector.broadcast %cst_30 : f32 to vector<8x32xf32>
    %109 = arith.subf %107, %108 : vector<8x32xf32>
    %110 = arith.mulf %103, %91 : vector<8x32xf32>
    %111 = arith.mulf %102, %109 : vector<8x32xf32>
    %112 = arith.addf %110, %111 : vector<8x32xf32>
    %113 = math.tanh %112 : vector<8x32xf32>
    %114 = arith.mulf %104, %113 : vector<8x32xf32>
    %115 = vector.extract_strided_slice %7 {offsets = [40, 0], sizes = [8, 128], strides = [1, 1]} : vector<64x128xf32> to vector<8x128xf32>
    %cst_31 = arith.constant dense<0.000000e+00> : vector<8x128xf32>
    %116 = tpu.matmul %114, %0, %cst_31 {dimension_numbers = #tpu.dot_dimension_numbers<[1], [0], [0], [1], [0, 0, 1, 1], [], []>} : vector<8x32xf32>, vector<32x128xf32>, vector<8x128xf32> -> vector<8x128xf32>
    %117 = arith.addf %115, %116 : vector<8x128xf32>
    %118 = arith.negf %117 : vector<8x128xf32>
    %119 = math.exp %118 : vector<8x128xf32>
    %cst_32 = arith.constant 1.000000e+00 : f32
    %120 = vector.broadcast %cst_32 : f32 to vector<8x128xf32>
    %121 = arith.addf %120, %119 : vector<8x128xf32>
    %122 = arith.divf %120, %121 : vector<8x128xf32>
    %123 = vector.extract_strided_slice %122 {offsets = [0, 0], sizes = [8, 32], strides = [1, 1]} : vector<8x128xf32> to vector<8x32xf32>
    %124 = vector.extract_strided_slice %122 {offsets = [0, 32], sizes = [8, 32], strides = [1, 1]} : vector<8x128xf32> to vector<8x32xf32>
    %125 = vector.extract_strided_slice %122 {offsets = [0, 64], sizes = [8, 32], strides = [1, 1]} : vector<8x128xf32> to vector<8x32xf32>
    %126 = vector.extract_strided_slice %122 {offsets = [0, 96], sizes = [8, 32], strides = [1, 1]} : vector<8x128xf32> to vector<8x32xf32>
    %cst_33 = arith.constant 2.000000e+00 : f32
    %127 = vector.broadcast %cst_33 : f32 to vector<8x32xf32>
    %128 = arith.mulf %127, %126 : vector<8x32xf32>
    %cst_34 = arith.constant 1.000000e+00 : f32
    %129 = vector.broadcast %cst_34 : f32 to vector<8x32xf32>
    %130 = arith.subf %128, %129 : vector<8x32xf32>
    %131 = arith.mulf %124, %112 : vector<8x32xf32>
    %132 = arith.mulf %123, %130 : vector<8x32xf32>
    %133 = arith.addf %131, %132 : vector<8x32xf32>
    %134 = math.tanh %133 : vector<8x32xf32>
    %135 = arith.mulf %125, %134 : vector<8x32xf32>
    %136 = vector.extract_strided_slice %7 {offsets = [48, 0], sizes = [8, 128], strides = [1, 1]} : vector<64x128xf32> to vector<8x128xf32>
    %cst_35 = arith.constant dense<0.000000e+00> : vector<8x128xf32>
    %137 = tpu.matmul %135, %0, %cst_35 {dimension_numbers = #tpu.dot_dimension_numbers<[1], [0], [0], [1], [0, 0, 1, 1], [], []>} : vector<8x32xf32>, vector<32x128xf32>, vector<8x128xf32> -> vector<8x128xf32>
    %138 = arith.addf %136, %137 : vector<8x128xf32>
    %139 = arith.negf %138 : vector<8x128xf32>
    %140 = math.exp %139 : vector<8x128xf32>
    %cst_36 = arith.constant 1.000000e+00 : f32
    %141 = vector.broadcast %cst_36 : f32 to vector<8x128xf32>
    %142 = arith.addf %141, %140 : vector<8x128xf32>
    %143 = arith.divf %141, %142 : vector<8x128xf32>
    %144 = vector.extract_strided_slice %143 {offsets = [0, 0], sizes = [8, 32], strides = [1, 1]} : vector<8x128xf32> to vector<8x32xf32>
    %145 = vector.extract_strided_slice %143 {offsets = [0, 32], sizes = [8, 32], strides = [1, 1]} : vector<8x128xf32> to vector<8x32xf32>
    %146 = vector.extract_strided_slice %143 {offsets = [0, 64], sizes = [8, 32], strides = [1, 1]} : vector<8x128xf32> to vector<8x32xf32>
    %147 = vector.extract_strided_slice %143 {offsets = [0, 96], sizes = [8, 32], strides = [1, 1]} : vector<8x128xf32> to vector<8x32xf32>
    %cst_37 = arith.constant 2.000000e+00 : f32
    %148 = vector.broadcast %cst_37 : f32 to vector<8x32xf32>
    %149 = arith.mulf %148, %147 : vector<8x32xf32>
    %cst_38 = arith.constant 1.000000e+00 : f32
    %150 = vector.broadcast %cst_38 : f32 to vector<8x32xf32>
    %151 = arith.subf %149, %150 : vector<8x32xf32>
    %152 = arith.mulf %145, %133 : vector<8x32xf32>
    %153 = arith.mulf %144, %151 : vector<8x32xf32>
    %154 = arith.addf %152, %153 : vector<8x32xf32>
    %155 = math.tanh %154 : vector<8x32xf32>
    %156 = arith.mulf %146, %155 : vector<8x32xf32>
    %157 = vector.extract_strided_slice %7 {offsets = [56, 0], sizes = [8, 128], strides = [1, 1]} : vector<64x128xf32> to vector<8x128xf32>
    %cst_39 = arith.constant dense<0.000000e+00> : vector<8x128xf32>
    %158 = tpu.matmul %156, %0, %cst_39 {dimension_numbers = #tpu.dot_dimension_numbers<[1], [0], [0], [1], [0, 0, 1, 1], [], []>} : vector<8x32xf32>, vector<32x128xf32>, vector<8x128xf32> -> vector<8x128xf32>
    %159 = arith.addf %157, %158 : vector<8x128xf32>
    %160 = arith.negf %159 : vector<8x128xf32>
    %161 = math.exp %160 : vector<8x128xf32>
    %cst_40 = arith.constant 1.000000e+00 : f32
    %162 = vector.broadcast %cst_40 : f32 to vector<8x128xf32>
    %163 = arith.addf %162, %161 : vector<8x128xf32>
    %164 = arith.divf %162, %163 : vector<8x128xf32>
    %165 = vector.extract_strided_slice %164 {offsets = [0, 0], sizes = [8, 32], strides = [1, 1]} : vector<8x128xf32> to vector<8x32xf32>
    %166 = vector.extract_strided_slice %164 {offsets = [0, 32], sizes = [8, 32], strides = [1, 1]} : vector<8x128xf32> to vector<8x32xf32>
    %167 = vector.extract_strided_slice %164 {offsets = [0, 64], sizes = [8, 32], strides = [1, 1]} : vector<8x128xf32> to vector<8x32xf32>
    %168 = vector.extract_strided_slice %164 {offsets = [0, 96], sizes = [8, 32], strides = [1, 1]} : vector<8x128xf32> to vector<8x32xf32>
    %cst_41 = arith.constant 2.000000e+00 : f32
    %169 = vector.broadcast %cst_41 : f32 to vector<8x32xf32>
    %170 = arith.mulf %169, %168 : vector<8x32xf32>
    %cst_42 = arith.constant 1.000000e+00 : f32
    %171 = vector.broadcast %cst_42 : f32 to vector<8x32xf32>
    %172 = arith.subf %170, %171 : vector<8x32xf32>
    %173 = arith.mulf %166, %154 : vector<8x32xf32>
    %174 = arith.mulf %165, %172 : vector<8x32xf32>
    %175 = arith.addf %173, %174 : vector<8x32xf32>
    %176 = math.tanh %175 : vector<8x32xf32>
    %177 = arith.mulf %167, %176 : vector<8x32xf32>
    %cst_43 = arith.constant 0.000000e+00 : f32
    %178 = vector.broadcast %cst_43 : f32 to vector<8x32xf32>
    %179 = arith.maximumf %177, %178 : vector<8x32xf32>
    %c0_44 = arith.constant 0 : index
    %c0_45 = arith.constant 0 : index
    %180 = vector.load %arg4[%c0_44, %c0_45] : memref<32x16xf32, #tpu.memory_space<vmem>>, vector<32x16xf32>
    %cst_46 = arith.constant dense<0.000000e+00> : vector<8x16xf32>
    %181 = tpu.matmul %179, %180, %cst_46 {dimension_numbers = #tpu.dot_dimension_numbers<[1], [0], [0], [1], [0, 0, 1, 1], [], []>} : vector<8x32xf32>, vector<32x16xf32>, vector<8x16xf32> -> vector<8x16xf32>
    %c0_47 = arith.constant 0 : index
    %c0_48 = arith.constant 0 : index
    %182 = vector.load %arg5[%c0_47, %c0_48] : memref<1x16xf32, #tpu.memory_space<vmem>>, vector<1x16xf32>
    %183 = vector.broadcast %182 : vector<1x16xf32> to vector<8x16xf32>
    %184 = arith.addf %181, %183 : vector<8x16xf32>
    %185 = vector.extract_strided_slice %184 {offsets = [0, 0], sizes = [8, 8], strides = [1, 1]} : vector<8x16xf32> to vector<8x8xf32>
    %186 = vector.extract_strided_slice %184 {offsets = [0, 8], sizes = [8, 8], strides = [1, 1]} : vector<8x16xf32> to vector<8x8xf32>
    %c0_49 = arith.constant 0 : index
    %c0_50 = arith.constant 0 : index
    %187 = vector.load %arg13[%c0_49, %c0_50] : memref<8x8xf32, #tpu.memory_space<vmem>>, vector<8x8xf32>
    tpu.vector_store %arg13[%c0_49, %c0_50], %185 {strides = array<i32>} : memref<8x8xf32, #tpu.memory_space<vmem>>, vector<8x8xf32>,
    %c0_51 = arith.constant 0 : index
    %c0_52 = arith.constant 0 : index
    %188 = vector.load %arg14[%c0_51, %c0_52] : memref<8x8xf32, #tpu.memory_space<vmem>>, vector<8x8xf32>
    tpu.vector_store %arg14[%c0_51, %c0_52], %186 {strides = array<i32>} : memref<8x8xf32, #tpu.memory_space<vmem>>, vector<8x8xf32>,
    %c0_53 = arith.constant 0 : index
    %c0_54 = arith.constant 0 : index
    %189 = vector.load %arg6[%c0_53, %c0_54] : memref<8x8xf32, #tpu.memory_space<vmem>>, vector<8x8xf32>
    %cst_55 = arith.constant 5.000000e-01 : f32
    %190 = vector.broadcast %cst_55 : f32 to vector<8x8xf32>
    %191 = arith.mulf %190, %186 : vector<8x8xf32>
    %192 = math.exp %191 : vector<8x8xf32>
    %193 = arith.mulf %189, %192 : vector<8x8xf32>
    %194 = arith.addf %193, %185 : vector<8x8xf32>
    %c0_56 = arith.constant 0 : index
    %c0_57 = arith.constant 0 : index
    %195 = vector.load %arg7[%c0_56, %c0_57] : memref<8x128xf32, #tpu.memory_space<vmem>>, vector<8x128xf32>
    %cst_58 = arith.constant dense<0.000000e+00> : vector<8x128xf32>
    %196 = tpu.matmul %194, %195, %cst_58 {dimension_numbers = #tpu.dot_dimension_numbers<[1], [0], [0], [1], [0, 0, 1, 1], [], []>} : vector<8x8xf32>, vector<8x128xf32>, vector<8x128xf32> -> vector<8x128xf32>
    %c0_59 = arith.constant 0 : index
    %c0_60 = arith.constant 0 : index
    %197 = vector.load %arg9[%c0_59, %c0_60] : memref<1x128xf32, #tpu.memory_space<vmem>>, vector<1x128xf32>
    %198 = vector.broadcast %197 : vector<1x128xf32> to vector<8x128xf32>
    %199 = arith.addf %196, %198 : vector<8x128xf32>
    %cst_61 = arith.constant 0.000000e+00 : f32
    %200 = vector.broadcast %cst_61 : f32 to vector<8x32xf32>
    %cst_62 = arith.constant 0.000000e+00 : f32
    %201 = vector.broadcast %cst_62 : f32 to vector<8x32xf32>
    %cst_63 = arith.constant dense<0.000000e+00> : vector<8x128xf32>
    %202 = tpu.matmul %200, %1, %cst_63 {dimension_numbers = #tpu.dot_dimension_numbers<[1], [0], [0], [1], [0, 0, 1, 1], [], []>} : vector<8x32xf32>, vector<32x128xf32>, vector<8x128xf32> -> vector<8x128xf32>
    %203 = arith.addf %199, %202 : vector<8x128xf32>
    %204 = arith.negf %203 : vector<8x128xf32>
    %205 = math.exp %204 : vector<8x128xf32>
    %cst_64 = arith.constant 1.000000e+00 : f32
    %206 = vector.broadcast %cst_64 : f32 to vector<8x128xf32>
    %207 = arith.addf %206, %205 : vector<8x128xf32>
    %208 = arith.divf %206, %207 : vector<8x128xf32>
    %209 = vector.extract_strided_slice %208 {offsets = [0, 0], sizes = [8, 32], strides = [1, 1]} : vector<8x128xf32> to vector<8x32xf32>
    %210 = vector.extract_strided_slice %208 {offsets = [0, 32], sizes = [8, 32], strides = [1, 1]} : vector<8x128xf32> to vector<8x32xf32>
    %211 = vector.extract_strided_slice %208 {offsets = [0, 64], sizes = [8, 32], strides = [1, 1]} : vector<8x128xf32> to vector<8x32xf32>
    %212 = vector.extract_strided_slice %208 {offsets = [0, 96], sizes = [8, 32], strides = [1, 1]} : vector<8x128xf32> to vector<8x32xf32>
    %cst_65 = arith.constant 2.000000e+00 : f32
    %213 = vector.broadcast %cst_65 : f32 to vector<8x32xf32>
    %214 = arith.mulf %213, %212 : vector<8x32xf32>
    %cst_66 = arith.constant 1.000000e+00 : f32
    %215 = vector.broadcast %cst_66 : f32 to vector<8x32xf32>
    %216 = arith.subf %214, %215 : vector<8x32xf32>
    %217 = arith.mulf %210, %201 : vector<8x32xf32>
    %218 = arith.mulf %209, %216 : vector<8x32xf32>
    %219 = arith.addf %217, %218 : vector<8x32xf32>
    %220 = math.tanh %219 : vector<8x32xf32>
    %221 = arith.mulf %211, %220 : vector<8x32xf32>
    %cst_67 = arith.constant dense<0.000000e+00> : vector<8x128xf32>
    %222 = tpu.matmul %221, %1, %cst_67 {dimension_numbers = #tpu.dot_dimension_numbers<[1], [0], [0], [1], [0, 0, 1, 1], [], []>} : vector<8x32xf32>, vector<32x128xf32>, vector<8x128xf32> -> vector<8x128xf32>
    %223 = arith.addf %199, %222 : vector<8x128xf32>
    %224 = arith.negf %223 : vector<8x128xf32>
    %225 = math.exp %224 : vector<8x128xf32>
    %cst_68 = arith.constant 1.000000e+00 : f32
    %226 = vector.broadcast %cst_68 : f32 to vector<8x128xf32>
    %227 = arith.addf %226, %225 : vector<8x128xf32>
    %228 = arith.divf %226, %227 : vector<8x128xf32>
    %229 = vector.extract_strided_slice %228 {offsets = [0, 0], sizes = [8, 32], strides = [1, 1]} : vector<8x128xf32> to vector<8x32xf32>
    %230 = vector.extract_strided_slice %228 {offsets = [0, 32], sizes = [8, 32], strides = [1, 1]} : vector<8x128xf32> to vector<8x32xf32>
    %231 = vector.extract_strided_slice %228 {offsets = [0, 64], sizes = [8, 32], strides = [1, 1]} : vector<8x128xf32> to vector<8x32xf32>
    %232 = vector.extract_strided_slice %228 {offsets = [0, 96], sizes = [8, 32], strides = [1, 1]} : vector<8x128xf32> to vector<8x32xf32>
    %cst_69 = arith.constant 2.000000e+00 : f32
    %233 = vector.broadcast %cst_69 : f32 to vector<8x32xf32>
    %234 = arith.mulf %233, %232 : vector<8x32xf32>
    %cst_70 = arith.constant 1.000000e+00 : f32
    %235 = vector.broadcast %cst_70 : f32 to vector<8x32xf32>
    %236 = arith.subf %234, %235 : vector<8x32xf32>
    %237 = arith.mulf %230, %219 : vector<8x32xf32>
    %238 = arith.mulf %229, %236 : vector<8x32xf32>
    %239 = arith.addf %237, %238 : vector<8x32xf32>
    %240 = math.tanh %239 : vector<8x32xf32>
    %241 = arith.mulf %231, %240 : vector<8x32xf32>
    %cst_71 = arith.constant dense<0.000000e+00> : vector<8x128xf32>
    %242 = tpu.matmul %241, %1, %cst_71 {dimension_numbers = #tpu.dot_dimension_numbers<[1], [0], [0], [1], [0, 0, 1, 1], [], []>} : vector<8x32xf32>, vector<32x128xf32>, vector<8x128xf32> -> vector<8x128xf32>
    %243 = arith.addf %199, %242 : vector<8x128xf32>
    %244 = arith.negf %243 : vector<8x128xf32>
    %245 = math.exp %244 : vector<8x128xf32>
    %cst_72 = arith.constant 1.000000e+00 : f32
    %246 = vector.broadcast %cst_72 : f32 to vector<8x128xf32>
    %247 = arith.addf %246, %245 : vector<8x128xf32>
    %248 = arith.divf %246, %247 : vector<8x128xf32>
    %249 = vector.extract_strided_slice %248 {offsets = [0, 0], sizes = [8, 32], strides = [1, 1]} : vector<8x128xf32> to vector<8x32xf32>
    %250 = vector.extract_strided_slice %248 {offsets = [0, 32], sizes = [8, 32], strides = [1, 1]} : vector<8x128xf32> to vector<8x32xf32>
    %251 = vector.extract_strided_slice %248 {offsets = [0, 64], sizes = [8, 32], strides = [1, 1]} : vector<8x128xf32> to vector<8x32xf32>
    %252 = vector.extract_strided_slice %248 {offsets = [0, 96], sizes = [8, 32], strides = [1, 1]} : vector<8x128xf32> to vector<8x32xf32>
    %cst_73 = arith.constant 2.000000e+00 : f32
    %253 = vector.broadcast %cst_73 : f32 to vector<8x32xf32>
    %254 = arith.mulf %253, %252 : vector<8x32xf32>
    %cst_74 = arith.constant 1.000000e+00 : f32
    %255 = vector.broadcast %cst_74 : f32 to vector<8x32xf32>
    %256 = arith.subf %254, %255 : vector<8x32xf32>
    %257 = arith.mulf %250, %239 : vector<8x32xf32>
    %258 = arith.mulf %249, %256 : vector<8x32xf32>
    %259 = arith.addf %257, %258 : vector<8x32xf32>
    %260 = math.tanh %259 : vector<8x32xf32>
    %261 = arith.mulf %251, %260 : vector<8x32xf32>
    %cst_75 = arith.constant dense<0.000000e+00> : vector<8x128xf32>
    %262 = tpu.matmul %261, %1, %cst_75 {dimension_numbers = #tpu.dot_dimension_numbers<[1], [0], [0], [1], [0, 0, 1, 1], [], []>} : vector<8x32xf32>, vector<32x128xf32>, vector<8x128xf32> -> vector<8x128xf32>
    %263 = arith.addf %199, %262 : vector<8x128xf32>
    %264 = arith.negf %263 : vector<8x128xf32>
    %265 = math.exp %264 : vector<8x128xf32>
    %cst_76 = arith.constant 1.000000e+00 : f32
    %266 = vector.broadcast %cst_76 : f32 to vector<8x128xf32>
    %267 = arith.addf %266, %265 : vector<8x128xf32>
    %268 = arith.divf %266, %267 : vector<8x128xf32>
    %269 = vector.extract_strided_slice %268 {offsets = [0, 0], sizes = [8, 32], strides = [1, 1]} : vector<8x128xf32> to vector<8x32xf32>
    %270 = vector.extract_strided_slice %268 {offsets = [0, 32], sizes = [8, 32], strides = [1, 1]} : vector<8x128xf32> to vector<8x32xf32>
    %271 = vector.extract_strided_slice %268 {offsets = [0, 64], sizes = [8, 32], strides = [1, 1]} : vector<8x128xf32> to vector<8x32xf32>
    %272 = vector.extract_strided_slice %268 {offsets = [0, 96], sizes = [8, 32], strides = [1, 1]} : vector<8x128xf32> to vector<8x32xf32>
    %cst_77 = arith.constant 2.000000e+00 : f32
    %273 = vector.broadcast %cst_77 : f32 to vector<8x32xf32>
    %274 = arith.mulf %273, %272 : vector<8x32xf32>
    %cst_78 = arith.constant 1.000000e+00 : f32
    %275 = vector.broadcast %cst_78 : f32 to vector<8x32xf32>
    %276 = arith.subf %274, %275 : vector<8x32xf32>
    %277 = arith.mulf %270, %259 : vector<8x32xf32>
    %278 = arith.mulf %269, %276 : vector<8x32xf32>
    %279 = arith.addf %277, %278 : vector<8x32xf32>
    %280 = math.tanh %279 : vector<8x32xf32>
    %281 = arith.mulf %271, %280 : vector<8x32xf32>
    %cst_79 = arith.constant dense<0.000000e+00> : vector<8x128xf32>
    %282 = tpu.matmul %281, %1, %cst_79 {dimension_numbers = #tpu.dot_dimension_numbers<[1], [0], [0], [1], [0, 0, 1, 1], [], []>} : vector<8x32xf32>, vector<32x128xf32>, vector<8x128xf32> -> vector<8x128xf32>
    %283 = arith.addf %199, %282 : vector<8x128xf32>
    %284 = arith.negf %283 : vector<8x128xf32>
    %285 = math.exp %284 : vector<8x128xf32>
    %cst_80 = arith.constant 1.000000e+00 : f32
    %286 = vector.broadcast %cst_80 : f32 to vector<8x128xf32>
    %287 = arith.addf %286, %285 : vector<8x128xf32>
    %288 = arith.divf %286, %287 : vector<8x128xf32>
    %289 = vector.extract_strided_slice %288 {offsets = [0, 0], sizes = [8, 32], strides = [1, 1]} : vector<8x128xf32> to vector<8x32xf32>
    %290 = vector.extract_strided_slice %288 {offsets = [0, 32], sizes = [8, 32], strides = [1, 1]} : vector<8x128xf32> to vector<8x32xf32>
    %291 = vector.extract_strided_slice %288 {offsets = [0, 64], sizes = [8, 32], strides = [1, 1]} : vector<8x128xf32> to vector<8x32xf32>
    %292 = vector.extract_strided_slice %288 {offsets = [0, 96], sizes = [8, 32], strides = [1, 1]} : vector<8x128xf32> to vector<8x32xf32>
    %cst_81 = arith.constant 2.000000e+00 : f32
    %293 = vector.broadcast %cst_81 : f32 to vector<8x32xf32>
    %294 = arith.mulf %293, %292 : vector<8x32xf32>
    %cst_82 = arith.constant 1.000000e+00 : f32
    %295 = vector.broadcast %cst_82 : f32 to vector<8x32xf32>
    %296 = arith.subf %294, %295 : vector<8x32xf32>
    %297 = arith.mulf %290, %279 : vector<8x32xf32>
    %298 = arith.mulf %289, %296 : vector<8x32xf32>
    %299 = arith.addf %297, %298 : vector<8x32xf32>
    %300 = math.tanh %299 : vector<8x32xf32>
    %301 = arith.mulf %291, %300 : vector<8x32xf32>
    %cst_83 = arith.constant dense<0.000000e+00> : vector<8x128xf32>
    %302 = tpu.matmul %301, %1, %cst_83 {dimension_numbers = #tpu.dot_dimension_numbers<[1], [0], [0], [1], [0, 0, 1, 1], [], []>} : vector<8x32xf32>, vector<32x128xf32>, vector<8x128xf32> -> vector<8x128xf32>
    %303 = arith.addf %199, %302 : vector<8x128xf32>
    %304 = arith.negf %303 : vector<8x128xf32>
    %305 = math.exp %304 : vector<8x128xf32>
    %cst_84 = arith.constant 1.000000e+00 : f32
    %306 = vector.broadcast %cst_84 : f32 to vector<8x128xf32>
    %307 = arith.addf %306, %305 : vector<8x128xf32>
    %308 = arith.divf %306, %307 : vector<8x128xf32>
    %309 = vector.extract_strided_slice %308 {offsets = [0, 0], sizes = [8, 32], strides = [1, 1]} : vector<8x128xf32> to vector<8x32xf32>
    %310 = vector.extract_strided_slice %308 {offsets = [0, 32], sizes = [8, 32], strides = [1, 1]} : vector<8x128xf32> to vector<8x32xf32>
    %311 = vector.extract_strided_slice %308 {offsets = [0, 64], sizes = [8, 32], strides = [1, 1]} : vector<8x128xf32> to vector<8x32xf32>
    %312 = vector.extract_strided_slice %308 {offsets = [0, 96], sizes = [8, 32], strides = [1, 1]} : vector<8x128xf32> to vector<8x32xf32>
    %cst_85 = arith.constant 2.000000e+00 : f32
    %313 = vector.broadcast %cst_85 : f32 to vector<8x32xf32>
    %314 = arith.mulf %313, %312 : vector<8x32xf32>
    %cst_86 = arith.constant 1.000000e+00 : f32
    %315 = vector.broadcast %cst_86 : f32 to vector<8x32xf32>
    %316 = arith.subf %314, %315 : vector<8x32xf32>
    %317 = arith.mulf %310, %299 : vector<8x32xf32>
    %318 = arith.mulf %309, %316 : vector<8x32xf32>
    %319 = arith.addf %317, %318 : vector<8x32xf32>
    %320 = math.tanh %319 : vector<8x32xf32>
    %321 = arith.mulf %311, %320 : vector<8x32xf32>
    %cst_87 = arith.constant dense<0.000000e+00> : vector<8x128xf32>
    %322 = tpu.matmul %321, %1, %cst_87 {dimension_numbers = #tpu.dot_dimension_numbers<[1], [0], [0], [1], [0, 0, 1, 1], [], []>} : vector<8x32xf32>, vector<32x128xf32>, vector<8x128xf32> -> vector<8x128xf32>
    %323 = arith.addf %199, %322 : vector<8x128xf32>
    %324 = arith.negf %323 : vector<8x128xf32>
    %325 = math.exp %324 : vector<8x128xf32>
    %cst_88 = arith.constant 1.000000e+00 : f32
    %326 = vector.broadcast %cst_88 : f32 to vector<8x128xf32>
    %327 = arith.addf %326, %325 : vector<8x128xf32>
    %328 = arith.divf %326, %327 : vector<8x128xf32>
    %329 = vector.extract_strided_slice %328 {offsets = [0, 0], sizes = [8, 32], strides = [1, 1]} : vector<8x128xf32> to vector<8x32xf32>
    %330 = vector.extract_strided_slice %328 {offsets = [0, 32], sizes = [8, 32], strides = [1, 1]} : vector<8x128xf32> to vector<8x32xf32>
    %331 = vector.extract_strided_slice %328 {offsets = [0, 64], sizes = [8, 32], strides = [1, 1]} : vector<8x128xf32> to vector<8x32xf32>
    %332 = vector.extract_strided_slice %328 {offsets = [0, 96], sizes = [8, 32], strides = [1, 1]} : vector<8x128xf32> to vector<8x32xf32>
    %cst_89 = arith.constant 2.000000e+00 : f32
    %333 = vector.broadcast %cst_89 : f32 to vector<8x32xf32>
    %334 = arith.mulf %333, %332 : vector<8x32xf32>
    %cst_90 = arith.constant 1.000000e+00 : f32
    %335 = vector.broadcast %cst_90 : f32 to vector<8x32xf32>
    %336 = arith.subf %334, %335 : vector<8x32xf32>
    %337 = arith.mulf %330, %319 : vector<8x32xf32>
    %338 = arith.mulf %329, %336 : vector<8x32xf32>
    %339 = arith.addf %337, %338 : vector<8x32xf32>
    %340 = math.tanh %339 : vector<8x32xf32>
    %341 = arith.mulf %331, %340 : vector<8x32xf32>
    %cst_91 = arith.constant dense<0.000000e+00> : vector<8x128xf32>
    %342 = tpu.matmul %341, %1, %cst_91 {dimension_numbers = #tpu.dot_dimension_numbers<[1], [0], [0], [1], [0, 0, 1, 1], [], []>} : vector<8x32xf32>, vector<32x128xf32>, vector<8x128xf32> -> vector<8x128xf32>
    %343 = arith.addf %199, %342 : vector<8x128xf32>
    %344 = arith.negf %343 : vector<8x128xf32>
    %345 = math.exp %344 : vector<8x128xf32>
    %cst_92 = arith.constant 1.000000e+00 : f32
    %346 = vector.broadcast %cst_92 : f32 to vector<8x128xf32>
    %347 = arith.addf %346, %345 : vector<8x128xf32>
    %348 = arith.divf %346, %347 : vector<8x128xf32>
    %349 = vector.extract_strided_slice %348 {offsets = [0, 0], sizes = [8, 32], strides = [1, 1]} : vector<8x128xf32> to vector<8x32xf32>
    %350 = vector.extract_strided_slice %348 {offsets = [0, 32], sizes = [8, 32], strides = [1, 1]} : vector<8x128xf32> to vector<8x32xf32>
    %351 = vector.extract_strided_slice %348 {offsets = [0, 64], sizes = [8, 32], strides = [1, 1]} : vector<8x128xf32> to vector<8x32xf32>
    %352 = vector.extract_strided_slice %348 {offsets = [0, 96], sizes = [8, 32], strides = [1, 1]} : vector<8x128xf32> to vector<8x32xf32>
    %cst_93 = arith.constant 2.000000e+00 : f32
    %353 = vector.broadcast %cst_93 : f32 to vector<8x32xf32>
    %354 = arith.mulf %353, %352 : vector<8x32xf32>
    %cst_94 = arith.constant 1.000000e+00 : f32
    %355 = vector.broadcast %cst_94 : f32 to vector<8x32xf32>
    %356 = arith.subf %354, %355 : vector<8x32xf32>
    %357 = arith.mulf %350, %339 : vector<8x32xf32>
    %358 = arith.mulf %349, %356 : vector<8x32xf32>
    %359 = arith.addf %357, %358 : vector<8x32xf32>
    %360 = math.tanh %359 : vector<8x32xf32>
    %361 = arith.mulf %351, %360 : vector<8x32xf32>
    %362 = tpu.concatenate %221, %241, %261, %281, %301, %321, %341, %361 in 0 : vector<8x32xf32>, vector<8x32xf32>, vector<8x32xf32>, vector<8x32xf32>, vector<8x32xf32>, vector<8x32xf32>, vector<8x32xf32>, vector<8x32xf32> -> vector<64x32xf32>
    %cst_95 = arith.constant 0.000000e+00 : f32
    %363 = vector.broadcast %cst_95 : f32 to vector<64x32xf32>
    %364 = arith.maximumf %362, %363 : vector<64x32xf32>
    %c0_96 = arith.constant 0 : index
    %c0_97 = arith.constant 0 : index
    %365 = vector.load %arg10[%c0_96, %c0_97] : memref<32x8xf32, #tpu.memory_space<vmem>>, vector<32x8xf32>
    %cst_98 = arith.constant dense<0.000000e+00> : vector<64x8xf32>
    %366 = tpu.matmul %364, %365, %cst_98 {dimension_numbers = #tpu.dot_dimension_numbers<[1], [0], [0], [1], [0, 0, 1, 1], [], []>} : vector<64x32xf32>, vector<32x8xf32>, vector<64x8xf32> -> vector<64x8xf32>
    %c0_99 = arith.constant 0 : index
    %c0_100 = arith.constant 0 : index
    %367 = vector.load %arg11[%c0_99, %c0_100] : memref<1x8xf32, #tpu.memory_space<vmem>>, vector<1x8xf32>
    %368 = vector.broadcast %367 : vector<1x8xf32> to vector<64x8xf32>
    %369 = arith.addf %366, %368 : vector<64x8xf32>
    %c0_101 = arith.constant 0 : index
    %c0_102 = arith.constant 0 : index
    %370 = vector.load %arg12[%c0_101, %c0_102] : memref<64x8xf32, #tpu.memory_space<vmem>>, vector<64x8xf32>
    tpu.vector_store %arg12[%c0_101, %c0_102], %369 {strides = array<i32>} : memref<64x8xf32, #tpu.memory_space<vmem>>, vector<64x8xf32>,
    return
  }
}

</mosaic_0001>

<bundles_post_ra>
// kernel: rvae_forward.1
= control target key start
LH: loop header
LB: loop body
LE: loop exit
PB: predicated region body
PF: predicated region fallthrough
CT: control target
= control target key end

     0   :  { %vm68_vm0 = vcmask 64512   ;;  %v2681_v3 = vmov 0.0   ;;  %vm2682_vm1 = vmmov 0   ;;  %s2684_s21 = smov 64   ;;  %vm198_vm2 = vcmask 261120   ;;  %s3244_s1 = inlined_call_operand.vmem [shape: f32[8,128], index: 1, kind: input, shape index: {}]   ;;  %s3245_s0 = inlined_call_operand.vmem [shape: f32[64,8], index: 0, kind: input, shape index: {}]   ;;  %s3246_s2 = inlined_call_operand.vmem [shape: f32[32,128], index: 2, kind: input, shape index: {}]   ;;  %s3247_s3 = inlined_call_operand.vmem [shape: f32[1,128], index: 3, kind: input, shape index: {}]   ;;  %s3248_s4 = inlined_call_operand.vmem [shape: f32[32,16], index: 4, kind: input, shape index: {}]   ;;  %s3249_s8 = inlined_call_operand.vmem [shape: f32[32,128], index: 8, kind: input, shape index: {}]   ;;  %s3250_s5 = inlined_call_operand.vmem [shape: f32[1,16], index: 5, kind: input, shape index: {}]   ;;  %s3251_s13 = inlined_call_operand.vmem [shape: f32[8,8], index: 13, kind: output, shape index: {1}]   ;;  %s3252_s7 = inlined_call_operand.vmem [shape: f32[8,128], index: 7, kind: input, shape index: {}]   ;;  %s3253_s6 = inlined_call_operand.vmem [shape: f32[8,8], index: 6, kind: input, shape index: {}]   ;;  %s3254_s9 = inlined_call_operand.vmem [shape: f32[1,128], index: 9, kind: input, shape index: {}]   ;;  %s3255_s10 = inlined_call_operand.vmem [shape: f32[32,8], index: 10, kind: input, shape index: {}]   ;;  %s3256_s14 = inlined_call_operand.vmem [shape: f32[8,8], index: 14, kind: output, shape index: {2}]   ;;  %s3257_s11 = inlined_call_operand.vmem [shape: f32[1,8], index: 11, kind: input, shape index: {}]   ;;  %s3258_s12 = inlined_call_operand.vmem [shape: f32[64,8], index: 12, kind: output, shape index: {0}]  }
   0x1   :  { %v60_v0 = vld [vmem:[%s3244_s1] sm:$0xff]  ;;  %v53_v2 = vld [vmem:[%s3245_s0 + $0x8] sm:$0xff]  ;;  %2388 = vmatprep.subr.mxu0 %v2681_v3  ;;  %2396 = vmatprep.mubr.msk.f32.mxu0 %vm2682_vm1, %v2681_v3  ;;  %v2777_v4 = vld [vmem:[%s3246_s2 + $0x18] sm:$0xff] }
   0x2   :  { %v52_v1 = vld [vmem:[%s3245_s0] sm:$0xff]  ;;  %2352 = vmatprep.subr.mxu1 %v60_v0  ;;  %v54_v5 = vld [vmem:[%s3245_s0 + $0x10] sm:$0xff]  ;;  %2389 = vmatpush3.msra.mxu0 %v2777_v4  ;;  %v55_v7 = vld [vmem:[%s3245_s0 + $0x18] sm:$0xff] }
   0x3   :  { %2354 = vmatprep.mubr.msk.f32.mxu1 %vm68_vm0, %v52_v1  ;;  %2353 = vmatpush3.msra.mxu1 %v60_v0  ;;  %v2788_v6 = vld [vmem:[%s3246_s2 + $0x10] sm:$0xff]  ;;  %v56_v8 = vld [vmem:[%s3245_s0 + $0x20] sm:$0xff]  ;;  %v2802_v9 = vld [vmem:[%s3246_s2 + $0x8] sm:$0xff] }
   0x4   :  { %2355 = vmatmul.mubr.msk.f32.vlgmr.msra.gmra.mxu1 %vm68_vm0, %v53_v2  ;;  %2366 = vmatprep.subr.mxu1 %v2681_v3  ;;  %v2812_v10 = vld [vmem:[%s3246_s2] sm:$0xff]  ;;  %v57_v11 = vld [vmem:[%s3245_s0 + $0x28] sm:$0xff]  ;;  %v58_v12 = vld [vmem:[%s3245_s0 + $0x30] sm:$0xff] }
   0x5   :  { %2367 = vmatpush3.msra.mxu1 %v2777_v4  ;;  %2357 = vmatprep.mubr.msk.f32.mxu1 %vm68_vm0, %v54_v5  ;;  %v59_v13 = vld [vmem:[%s3245_s0 + $0x38] sm:$0xff]  ;;  %v2176_v14 = vld [vmem:[%s3247_s3] ss:$0 sm:$0xff]  ;;  %s2683_s3 = smov 32  }
   0x6   :  { %2368 = vmatprep.subr.mxu1 %v2681_v3  ;;  %2390 = vmatprep.subr.mxu0 %v2681_v3 }
   0x7   :  { %2369 = vmatpush3.msra.mxu1 %v2788_v6  ;;  %2391 = vmatpush3.msra.mxu0 %v2788_v6 }
   0x8   :  { %2358 = vmatmul.mubr.msk.f32.gmra.mxu1 %vm68_vm0, %v55_v7  ;;  %2370 = vmatprep.subr.mxu1 %v2681_v3 }
   0x9   :  { %2360 = vmatprep.mubr.msk.f32.mxu1 %vm68_vm0, %v56_v8  ;;  %2371 = vmatpush3.msra.mxu1 %v2802_v9 }
   0xa   :  { %2372 = vmatprep.subr.mxu1 %v2681_v3  ;;  %2392 = vmatprep.subr.mxu0 %v2681_v3 }
   0xb   :  { %2373 = vmatpush3.msra.mxu1 %v2812_v10  ;;  %2393 = vmatpush3.msra.mxu0 %v2802_v9 }
   0xc   :  { %2361 = vmatmul.mubr.msk.f32.gmra.mxu1 %vm68_vm0, %v57_v11  ;;  %2377 = vmatprep.subr.mxu1 %v2681_v3 }
   0xd   :  { %2363 = vmatprep.mubr.msk.f32.mxu1 %vm68_vm0, %v58_v12  ;;  %2394 = vmatprep.subr.mxu0 %v2681_v3 }
   0xe   :  { %2395 = vmatpush3.msra.mxu0 %v2812_v10 }
   0xf   :  { %2410 = vmatprep.subr.mxu0 %v2681_v3 }
  0x10   :  { %2364 = vmatmul.mubr.msk.f32.gmra.mxu1 %vm68_vm0, %v59_v13 }
  0x11   :  { %2374 = vmatprep.mubr.msk.f32.mxu1 %vm2682_vm1, %v2681_v3 }
  0x14   :  { %2375 = vmatmul.mubr.f32.vlgmr.msra.gmra.mxu1 %v2681_v3 }
  0x15   :  { %2378 = vmatpush3.msra.mxu1 %v2777_v4  ;;  %2385 = vmatprep.mubr.msk.f32.mxu1 %vm2682_vm1, %v2681_v3 }
  0x16   :  { %2379 = vmatprep.subr.mxu1 %v2681_v3 }
  0x17   :  { %2380 = vmatpush3.msra.mxu1 %v2788_v6 }
  0x18   :  { %2381 = vmatprep.subr.mxu1 %v2681_v3 }
  0x19   :  { %2382 = vmatpush3.msra.mxu1 %v2802_v9 }
  0x1a   :  { %2383 = vmatprep.subr.mxu1 %v2681_v3 }
  0x1b   :  { %2384 = vmatpush3.msra.mxu1 %v2812_v10 }
  0x1c   :  { %2399 = vmatprep.subr.mxu1 %v2681_v3 }
  0xc4   :  { %v2356_v15 = vpop.f32.mrf.mxu1 }
  0xc5   :  { %v165_v16 = vadd.f32 %v2356_v15, %v2176_v14 }
  0xc6   :  { %v159_v17 = vpop.f32.mrf.mxu1 }
  0xc7   :  { %v160_v29 = vadd.f32 %v2176_v14, %v159_v17 }
  0xc8   :  { %v2359_v18 = vpop.f32.mrf.mxu1 }
  0xc9   :  { %v2852_v19 = vadd.f32 %v2359_v18, %v2176_v14 }
  0xca   :  { %v169_v20 = vpop.f32.mrf.mxu1 }
  0xcb   :  { %v2854_v21 = vadd.f32 %v2176_v14, %v169_v20 }
  0xcc   :  { %v2362_v22 = vpop.f32.mrf.mxu1 }
  0xcd   :  { %v2856_v23 = vadd.f32 %v2362_v22, %v2176_v14 }
  0xce   :  { %v179_v24 = vpop.f32.mrf.mxu1 }
  0xcf   :  { %v2858_v25 = vadd.f32 %v2176_v14, %v179_v24 }
  0xd0   :  { %v2365_v26 = vpop.f32.mrf.mxu1 }
  0xd1   :  { %v2860_v27 = vadd.f32 %v2365_v26, %v2176_v14 }
  0xd2   :  { %v189_v28 = vpop.f32.mrf.mxu1 }
  0xd3   :  { %v2862_v30 = vadd.f32 %v2176_v14, %v189_v28 }
  0xd4   :  { %v268_v31 = vpop.f32.mrf.mxu1 }
  0xd5   :  { %v272_v32 = vadd.f32 %v268_v31, %v160_v29 }
  0xd6   :  { %v2376_v33 = vpop.f32.mrf.mxu1 }
  0xd7   :  { %v2185_v34 = vmul.f32 -1.442695, %v272_v32 }
  0xd9   :  { %2583 = vpow2.f32 %v2185_v34 }
  0xe6   :  { %v2584_v35 = vpop.eup %2583 }
  0xe7   :  { %v276_v36 = vadd.f32 1.0, %v2584_v35 }
  0xe9   :  { %2585 = vrcp.f32 %v276_v36 }
  0xf6   :  { %v2586_v37 = vpop.eup %2585 }
  0xf7   :  { %v279_v38 = vmul.f32 2.0, %v2586_v37  ;;  %v281_v42 = vmul.f32 0.0, %v2586_v37 }
  0xf9   :  { %v2186_v39 = vadd.f32 -1.0, %v279_v38 }
  0xfb   :  { %283 = vrot.lane.b32.xlu0 %v2186_v39, %s2683_s3 }
 0x16d   :  { %v284_v40 = vpop.permute.xlu0 %283 }
 0x16e   :  { %v286_v41 = vmul.f32 %v2586_v37, %v284_v40 }
 0x170   :  { %288 = vrot.lane.b32.xlu0 %v286_v41, %s2683_s3 }
 0x1e2   :  { %v289_v43 = vpop.permute.xlu0 %288 }
 0x1e3   :  { %v291_v44 = vadd.f32 %v289_v43, %v281_v42 }
 0x1e5   :  { %2587 = vtanh.f32 %v291_v44 }
 0x1f2   :  { %v2588_v45 = vpop.eup %2587 }
 0x1f3   :  { %294 = vrot.lane.b32.xlu1 %v2588_v45, %s2683_s3 }
 0x265   :  { %v295_v46 = vpop.permute.xlu1 %294 }
 0x266   :  { %v297_v47 = vmul.f32 %v2586_v37, %v295_v46 }
 0x268   :  { %299 = vrot.lane.b32.xlu1 %v297_v47, %s2684_s21 }
 0x2da   :  { %v300_v48 = vpop.permute.xlu1 %299 }
 0x2db   :  { %2386 = vmatmul.mubr.msk.f32.vlgmr.msra.gmra.mxu1 %vm198_vm2, %v300_v48 }
 0x2dc   :  { %2400 = vmatpush3.msra.mxu1 %v2777_v4  ;;  %2407 = vmatprep.mubr.msk.f32.mxu1 %vm2682_vm1, %v2681_v3 }
 0x2dd   :  { %2401 = vmatprep.subr.mxu1 %v2681_v3 }
 0x2de   :  { %2402 = vmatpush3.msra.mxu1 %v2788_v6 }
 0x2df   :  { %2403 = vmatprep.subr.mxu1 %v2681_v3 }
 0x2e0   :  { %2404 = vmatpush3.msra.mxu1 %v2802_v9 }
 0x2e1   :  { %2405 = vmatprep.subr.mxu1 %v2681_v3 }
 0x2e2   :  { %2406 = vmatpush3.msra.mxu1 %v2812_v10 }
 0x2e3   :  { %2421 = vmatprep.subr.mxu1 %v2681_v3 }
 0x39b   :  { %v369_v49 = vpop.f32.mrf.mxu1 }
 0x39c   :  { %v373_v50 = vadd.f32 %v369_v49, %v165_v16 }
 0x39d   :  { %v2387_v51 = vpop.f32.mrf.mxu1 }
 0x39e   :  { %v2188_v52 = vmul.f32 -1.442695, %v373_v50 }
 0x3a0   :  { %2589 = vpow2.f32 %v2188_v52 }
 0x3ad   :  { %v2590_v53 = vpop.eup %2589 }
 0x3ae   :  { %v377_v54 = vadd.f32 1.0, %v2590_v53 }
 0x3b0   :  { %2591 = vrcp.f32 %v377_v54 }
 0x3bd   :  { %v2592_v55 = vpop.eup %2591 }
 0x3be   :  { %v380_v56 = vmul.f32 2.0, %v2592_v55  ;;  %v382_v60 = vmul.f32 %v2592_v55, %v291_v44 }
 0x3c0   :  { %v2189_v57 = vadd.f32 -1.0, %v380_v56 }
 0x3c2   :  { %384 = vrot.lane.b32.xlu0 %v2189_v57, %s2683_s3 }
 0x434   :  { %v385_v58 = vpop.permute.xlu0 %384 }
 0x435   :  { %v387_v59 = vmul.f32 %v2592_v55, %v385_v58 }
 0x437   :  { %389 = vrot.lane.b32.xlu1 %v387_v59, %s2683_s3 }
 0x4a9   :  { %v390_v61 = vpop.permute.xlu1 %389 }
 0x4aa   :  { %v392_v62 = vadd.f32 %v390_v61, %v382_v60 }
 0x4ac   :  { %2593 = vtanh.f32 %v392_v62 }
 0x4b9   :  { %v2594_v63 = vpop.eup %2593 }
 0x4ba   :  { %395 = vrot.lane.b32.xlu0 %v2594_v63, %s2683_s3 }
 0x52c   :  { %v396_v0 = vpop.permute.xlu0 %395 }
 0x52d   :  { %v398_v1 = vmul.f32 %v2592_v55, %v396_v0 }
 0x52f   :  { %400 = vrot.lane.b32.xlu1 %v398_v1, %s2684_s21 }
 0x5a1   :  { %v401_v2 = vpop.permute.xlu1 %400 }
 0x5a2   :  { %2397 = vmatmul.mubr.msk.f32.vlgmr.msra.gmra.mxu0 %vm198_vm2, %v401_v2 }
 0x5a3   :  { %2411 = vmatpush3.msra.mxu0 %v2777_v4  ;;  %2418 = vmatprep.mubr.msk.f32.mxu0 %vm2682_vm1, %v2681_v3 }
 0x5a4   :  { %2412 = vmatprep.subr.mxu0 %v2681_v3 }
 0x5a5   :  { %2413 = vmatpush3.msra.mxu0 %v2788_v6 }
 0x5a6   :  { %2414 = vmatprep.subr.mxu0 %v2681_v3 }
 0x5a7   :  { %2415 = vmatpush3.msra.mxu0 %v2802_v9 }
 0x5a8   :  { %2416 = vmatprep.subr.mxu0 %v2681_v3 }
 0x5a9   :  { %2417 = vmatpush3.msra.mxu0 %v2812_v10 }
 0x5aa   :  { %2432 = vmatprep.subr.mxu0 %v2681_v3 }
 0x662   :  { %v470_v5 = vpop.f32.mrf.mxu0 }
 0x663   :  { %v474_v7 = vadd.f32 %v470_v5, %v2854_v21 }
 0x664   :  { %v2398_v8 = vpop.f32.mrf.mxu0 }
 0x665   :  { %v2191_v11 = vmul.f32 -1.442695, %v474_v7 }
 0x667   :  { %2595 = vpow2.f32 %v2191_v11 }
 0x674   :  { %v2596_v12 = vpop.eup %2595 }
 0x675   :  { %v478_v13 = vadd.f32 1.0, %v2596_v12 }
 0x677   :  { %2597 = vrcp.f32 %v478_v13 }
 0x684   :  { %v2598_v14 = vpop.eup %2597 }
 0x685   :  { %v481_v15 = vmul.f32 2.0, %v2598_v14  ;;  %v483_v20 = vmul.f32 %v2598_v14, %v392_v62 }
 0x687   :  { %v2192_v16 = vadd.f32 -1.0, %v481_v15 }
 0x689   :  { %485 = vrot.lane.b32.xlu0 %v2192_v16, %s2683_s3 }
 0x6fb   :  { %v486_v17 = vpop.permute.xlu0 %485 }
 0x6fc   :  { %v488_v18 = vmul.f32 %v2598_v14, %v486_v17 }
 0x6fe   :  { %490 = vrot.lane.b32.xlu1 %v488_v18, %s2683_s3 }
 0x770   :  { %v491_v22 = vpop.permute.xlu1 %490 }
 0x771   :  { %v493_v24 = vadd.f32 %v491_v22, %v483_v20 }
 0x773   :  { %2599 = vtanh.f32 %v493_v24 }
 0x780   :  { %v2600_v21 = vpop.eup %2599 }
 0x781   :  { %496 = vrot.lane.b32.xlu0 %v2600_v21, %s2683_s3 }
 0x7f3   :  { %v497_v26 = vpop.permute.xlu0 %496 }
 0x7f4   :  { %v499_v28 = vmul.f32 %v2598_v14, %v497_v26 }
 0x7f6   :  { %501 = vrot.lane.b32.xlu1 %v499_v28, %s2684_s21 }
 0x868   :  { %v502_v29 = vpop.permute.xlu1 %501 }
 0x869   :  { %2408 = vmatmul.mubr.msk.f32.vlgmr.msra.gmra.mxu1 %vm198_vm2, %v502_v29 }
 0x86a   :  { %2422 = vmatpush3.msra.mxu1 %v2777_v4  ;;  %2429 = vmatprep.mubr.msk.f32.mxu1 %vm2682_vm1, %v2681_v3 }
 0x86b   :  { %2423 = vmatprep.subr.mxu1 %v2681_v3 }
 0x86c   :  { %2424 = vmatpush3.msra.mxu1 %v2788_v6 }
 0x86d   :  { %2425 = vmatprep.subr.mxu1 %v2681_v3 }
 0x86e   :  { %2426 = vmatpush3.msra.mxu1 %v2802_v9 }
 0x86f   :  { %2427 = vmatprep.subr.mxu1 %v2681_v3 }
 0x870   :  { %2428 = vmatpush3.msra.mxu1 %v2812_v10 }
 0x871   :  { %2443 = vmatprep.subr.mxu1 %v2681_v3 }
 0x929   :  { %v571_v31 = vpop.f32.mrf.mxu1 }
 0x92a   :  { %v575_v32 = vadd.f32 %v571_v31, %v2852_v19 }
 0x92b   :  { %v2409_v33 = vpop.f32.mrf.mxu1 }
 0x92c   :  { %v2194_v34 = vmul.f32 -1.442695, %v575_v32 }
 0x92e   :  { %2601 = vpow2.f32 %v2194_v34 }
 0x93b   :  { %v2602_v35 = vpop.eup %2601 }
 0x93c   :  { %v579_v36 = vadd.f32 1.0, %v2602_v35 }
 0x93e   :  { %2603 = vrcp.f32 %v579_v36 }
 0x94b   :  { %v2604_v37 = vpop.eup %2603 }
 0x94c   :  { %v582_v38 = vmul.f32 2.0, %v2604_v37  ;;  %v584_v42 = vmul.f32 %v2604_v37, %v493_v24 }
 0x94e   :  { %v2195_v39 = vadd.f32 -1.0, %v582_v38 }
 0x950   :  { %586 = vrot.lane.b32.xlu0 %v2195_v39, %s2683_s3 }
 0x9c2   :  { %v587_v40 = vpop.permute.xlu0 %586 }
 0x9c3   :  { %v589_v41 = vmul.f32 %v2604_v37, %v587_v40 }
 0x9c5   :  { %591 = vrot.lane.b32.xlu1 %v589_v41, %s2683_s3 }
 0xa37   :  { %v592_v43 = vpop.permute.xlu1 %591 }
 0xa38   :  { %v594_v44 = vadd.f32 %v592_v43, %v584_v42 }
 0xa3a   :  { %2605 = vtanh.f32 %v594_v44 }
 0xa47   :  { %v2606_v19 = vpop.eup %2605 }
 0xa48   :  { %597 = vrot.lane.b32.xlu0 %v2606_v19, %s2683_s3 }
 0xaba   :  { %v598_v45 = vpop.permute.xlu0 %597 }
 0xabb   :  { %v600_v46 = vmul.f32 %v2604_v37, %v598_v45 }
 0xabd   :  { %602 = vrot.lane.b32.xlu1 %v600_v46, %s2684_s21 }
 0xb2f   :  { %v603_v47 = vpop.permute.xlu1 %602 }
 0xb30   :  { %2419 = vmatmul.mubr.msk.f32.vlgmr.msra.gmra.mxu0 %vm198_vm2, %v603_v47 }
 0xb31   :  { %2433 = vmatpush3.msra.mxu0 %v2777_v4  ;;  %2440 = vmatprep.mubr.msk.f32.mxu0 %vm2682_vm1, %v2681_v3 }
 0xb32   :  { %2434 = vmatprep.subr.mxu0 %v2681_v3 }
 0xb33   :  { %2435 = vmatpush3.msra.mxu0 %v2788_v6 }
 0xb34   :  { %2436 = vmatprep.subr.mxu0 %v2681_v3 }
 0xb35   :  { %2437 = vmatpush3.msra.mxu0 %v2802_v9 }
 0xb36   :  { %2438 = vmatprep.subr.mxu0 %v2681_v3 }
 0xb37   :  { %2439 = vmatpush3.msra.mxu0 %v2812_v10 }
 0xb38   :  { %2454 = vmatprep.subr.mxu0 %v2681_v3 }
 0xbf0   :  { %v672_v48 = vpop.f32.mrf.mxu0 }
 0xbf1   :  { %v676_v49 = vadd.f32 %v672_v48, %v2858_v25 }
 0xbf2   :  { %v2420_v50 = vpop.f32.mrf.mxu0 }
 0xbf3   :  { %v2197_v51 = vmul.f32 -1.442695, %v676_v49 }
 0xbf5   :  { %2607 = vpow2.f32 %v2197_v51 }
 0xc02   :  { %v2608_v52 = vpop.eup %2607 }
 0xc03   :  { %v680_v53 = vadd.f32 1.0, %v2608_v52 }
 0xc05   :  { %2609 = vrcp.f32 %v680_v53 }
 0xc12   :  { %v2610_v54 = vpop.eup %2609 }
 0xc13   :  { %v683_v55 = vmul.f32 2.0, %v2610_v54  ;;  %v685_v59 = vmul.f32 %v2610_v54, %v594_v44 }
 0xc15   :  { %v2198_v56 = vadd.f32 -1.0, %v683_v55  ;;  %v1007_v55 = vld [vmem:[%s3248_s4 + $0x8] sm:$0xff] }
 0xc17   :  { %687 = vrot.lane.b32.xlu0 %v2198_v56, %s2683_s3  ;;  %v1006_v56 = vld [vmem:[%s3248_s4] sm:$0xff] }
 0xc89   :  { %v688_v57 = vpop.permute.xlu0 %687 }
 0xc8a   :  { %v690_v58 = vmul.f32 %v2610_v54, %v688_v57 }
 0xc8c   :  { %692 = vrot.lane.b32.xlu1 %v690_v58, %s2683_s3 }
 0xcfe   :  { %v693_v60 = vpop.permute.xlu1 %692 }
 0xcff   :  { %v695_v61 = vadd.f32 %v693_v60, %v685_v59 }
 0xd01   :  { %2611 = vtanh.f32 %v695_v61 }
 0xd0e   :  { %v2612_v25 = vpop.eup %2611 }
 0xd0f   :  { %698 = vrot.lane.b32.xlu0 %v2612_v25, %s2683_s3  ;;  %v2985_v25 = vld [vmem:[%s3249_s8 + $0x18] sm:$0xff] }
 0xd81   :  { %v699_v62 = vpop.permute.xlu0 %698 }
 0xd82   :  { %v701_v63 = vmul.f32 %v2610_v54, %v699_v62  ;;  %v1008_v54 = vld [vmem:[%s3248_s4 + $0x10] sm:$0xff]  ;;  %v2208_v62 = vld [vmem:[%s3250_s5] ss:$0 sm:$0xff] }
 0xd84   :  { %703 = vrot.lane.b32.xlu1 %v701_v63, %s2684_s21 }
 0xdf6   :  { %v704_v0 = vpop.permute.xlu1 %703 }
 0xdf7   :  { %2430 = vmatmul.mubr.msk.f32.vlgmr.msra.gmra.mxu1 %vm198_vm2, %v704_v0 }
 0xdf8   :  { %2444 = vmatpush3.msra.mxu1 %v2777_v4  ;;  %2451 = vmatprep.mubr.msk.f32.mxu1 %vm2682_vm1, %v2681_v3 }
 0xdf9   :  { %2445 = vmatprep.subr.mxu1 %v2681_v3 }
 0xdfa   :  { %2446 = vmatpush3.msra.mxu1 %v2788_v6 }
 0xdfb   :  { %2447 = vmatprep.subr.mxu1 %v2681_v3 }
 0xdfc   :  { %2448 = vmatpush3.msra.mxu1 %v2802_v9 }
 0xdfd   :  { %2449 = vmatprep.subr.mxu1 %v2681_v3 }
 0xdfe   :  { %2450 = vmatpush3.msra.mxu1 %v2812_v10 }
 0xdff   :  { %2465 = vmatprep.subr.mxu1 %v2681_v3 }
 0xeb7   :  { %v773_v1 = vpop.f32.mrf.mxu1 }
 0xeb8   :  { %v777_v4 = vadd.f32 %v773_v1, %v2856_v23 }
 0xeb9   :  { %v2431_v2 = vpop.f32.mrf.mxu1 }
 0xeba   :  { %v2200_v5 = vmul.f32 -1.442695, %v777_v4 }
 0xebc   :  { %2613 = vpow2.f32 %v2200_v5  ;;  %v3003_v5 = vld [vmem:[%s3249_s8 + $0x10] sm:$0xff] }
 0xec9   :  { %v2614_v7 = vpop.eup %2613 }
 0xeca   :  { %v781_v8 = vadd.f32 1.0, %v2614_v7  ;;  %v3010_v7 = vld [vmem:[%s3249_s8 + $0x8] sm:$0xff] }
 0xecc   :  { %2615 = vrcp.f32 %v781_v8  ;;  %v1108_v8 = vld [vmem:[%s3252_s7] sm:$0xff]  ;;  %s2685_s7 = smov 120  }
 0xed9   :  { %v2616_v6 = vpop.eup %2615 }
 0xeda   :  { %v784_v11 = vmul.f32 2.0, %v2616_v6  ;;  %v786_v10 = vmul.f32 %v2616_v6, %v695_v61 }
 0xedc   :  { %v2201_v12 = vadd.f32 -1.0, %v784_v11 }
 0xede   :  { %788 = vrot.lane.b32.xlu0 %v2201_v12, %s2683_s3  ;;  %v1098_v12 = vld [vmem:[%s3253_s6] sm:$0xff] }
 0xf50   :  { %v789_v9 = vpop.permute.xlu0 %788 }
 0xf51   :  { %v791_v13 = vmul.f32 %v2616_v6, %v789_v9 }
 0xf53   :  { %793 = vrot.lane.b32.xlu1 %v791_v13, %s2683_s3 }
 0xfc5   :  { %v794_v14 = vpop.permute.xlu1 %793 }
 0xfc6   :  { %v796_v15 = vadd.f32 %v794_v14, %v786_v10 }
 0xfc8   :  { %2617 = vtanh.f32 %v796_v15 }
 0xfd5   :  { %v2618_v23 = vpop.eup %2617 }
 0xfd6   :  { %799 = vrot.lane.b32.xlu0 %v2618_v23, %s2683_s3  ;;  %v2210_v23 = vld [vmem:[%s3254_s9] ss:$0 sm:$0xff] }
0x1048   :  { %v800_v16 = vpop.permute.xlu0 %799 }
0x1049   :  { %v802_v17 = vmul.f32 %v2616_v6, %v800_v16  ;;  %v3020_v6 = vld [vmem:[%s3249_s8] sm:$0xff] }
0x104b   :  { %804 = vrot.lane.b32.xlu1 %v802_v17, %s2684_s21 }
0x10bd   :  { %v805_v18 = vpop.permute.xlu1 %804 }
0x10be   :  { %2441 = vmatmul.mubr.msk.f32.vlgmr.msra.gmra.mxu0 %vm198_vm2, %v805_v18 }
0x10bf   :  { %2462 = vmatprep.mubr.msk.f32.mxu0 %vm2682_vm1, %v2681_v3 }
0x117e   :  { %v874_v20 = vpop.f32.mrf.mxu0 }
0x117f   :  { %v878_v22 = vadd.f32 %v874_v20, %v2862_v30 }
0x1180   :  { %v2442_v24 = vpop.f32.mrf.mxu0 }
0x1181   :  { %v2203_v21 = vmul.f32 -1.442695, %v878_v22 }
0x1183   :  { %2619 = vpow2.f32 %v2203_v21 }
0x1190   :  { %v2620_v26 = vpop.eup %2619 }
0x1191   :  { %v882_v28 = vadd.f32 1.0, %v2620_v26 }
0x1193   :  { %2621 = vrcp.f32 %v882_v28 }
0x11a0   :  { %v2622_v29 = vpop.eup %2621 }
0x11a1   :  { %v885_v31 = vmul.f32 2.0, %v2622_v29  ;;  %v887_v35 = vmul.f32 %v2622_v29, %v796_v15 }
0x11a3   :  { %v2204_v32 = vadd.f32 -1.0, %v885_v31 }
0x11a5   :  { %889 = vrot.lane.b32.xlu0 %v2204_v32, %s2683_s3 }
0x1217   :  { %v890_v33 = vpop.permute.xlu0 %889 }
0x1218   :  { %v892_v34 = vmul.f32 %v2622_v29, %v890_v33 }
0x121a   :  { %894 = vrot.lane.b32.xlu1 %v892_v34, %s2683_s3 }
0x128c   :  { %v895_v36 = vpop.permute.xlu1 %894 }
0x128d   :  { %v897_v37 = vadd.f32 %v895_v36, %v887_v35 }
0x128f   :  { %2623 = vtanh.f32 %v897_v37 }
0x129c   :  { %v2624_v30 = vpop.eup %2623 }
0x129d   :  { %900 = vrot.lane.b32.xlu0 %v2624_v30, %s2683_s3 }
0x130f   :  { %v901_v38 = vpop.permute.xlu0 %900 }
0x1310   :  { %v903_v39 = vmul.f32 %v2622_v29, %v901_v38 }
0x1312   :  { %905 = vrot.lane.b32.xlu1 %v903_v39, %s2684_s21 }
0x1384   :  { %v906_v40 = vpop.permute.xlu1 %905 }
0x1385   :  { %2452 = vmatmul.mubr.msk.f32.vlgmr.msra.gmra.mxu1 %vm198_vm2, %v906_v40 }
0x1386   :  { %2467 = vmatprep.mubr.msk.f32.mxu1 %vm2682_vm1, %v2681_v3  ;;  %2466 = vmatpush3.msra.mxu1 %v1108_v8 }
0x1387   :  { %2481 = vmatprep.subr.mxu1 %v2681_v3 }
0x1445   :  { %v975_v41 = vpop.f32.mrf.mxu1 }
0x1446   :  { %v979_v42 = vadd.f32 %v975_v41, %v2860_v27  ;;  %v1009_v27 = vld [vmem:[%s3248_s4 + $0x18] sm:$0xff] }
0x1447   :  { %v2453_v43 = vpop.f32.mrf.mxu1  ;;  %2455 = vmatpush3.msra.mxu0 %v1009_v27 }
0x1448   :  { %v2206_v44 = vmul.f32 -1.442695, %v979_v42  ;;  %2456 = vmatprep.subr.mxu0 %v2681_v3 }
0x1449   :  { %2457 = vmatpush3.msra.mxu0 %v1008_v54 }
0x144a   :  { %2625 = vpow2.f32 %v2206_v44  ;;  %2458 = vmatprep.subr.mxu0 %v2681_v3 }
0x144b   :  { %2459 = vmatpush3.msra.mxu0 %v1007_v55 }
0x144c   :  { %2460 = vmatprep.subr.mxu0 %v2681_v3 }
0x144d   :  { %2461 = vmatpush3.msra.mxu0 %v1006_v56 }
0x144e   :  { %2470 = vmatprep.subr.mxu0 %v2681_v3 }
0x1457   :  { %v2626_v19 = vpop.eup %2625 }
0x1458   :  { %v983_v45 = vadd.f32 1.0, %v2626_v19 }
0x145a   :  { %2627 = vrcp.f32 %v983_v45 }
0x1467   :  { %v2628_v46 = vpop.eup %2627 }
0x1468   :  { %v986_v47 = vmul.f32 2.0, %v2628_v46  ;;  %v988_v51 = vmul.f32 %v2628_v46, %v897_v37 }
0x146a   :  { %v2207_v48 = vadd.f32 -1.0, %v986_v47 }
0x146c   :  { %990 = vrot.lane.b32.xlu0 %v2207_v48, %s2683_s3 }
0x14de   :  { %v991_v49 = vpop.permute.xlu0 %990 }
0x14df   :  { %v993_v50 = vmul.f32 %v2628_v46, %v991_v49 }
0x14e1   :  { %995 = vrot.lane.b32.xlu1 %v993_v50, %s2683_s3 }
0x1553   :  { %v996_v52 = vpop.permute.xlu1 %995 }
0x1554   :  { %v998_v53 = vadd.f32 %v996_v52, %v988_v51 }
0x1556   :  { %2629 = vtanh.f32 %v998_v53 }
0x1563   :  { %v2630_v57 = vpop.eup %2629 }
0x1564   :  { %1001 = vrot.lane.b32.xlu0 %v2630_v57, %s2683_s3 }
0x15d6   :  { %v1002_v58 = vpop.permute.xlu0 %1001 }
0x15d7   :  { %v1004_v59 = vmul.f32 %v2628_v46, %v1002_v58 }
0x15d9   :  { %v1005_v60 = vmax.f32 %v1004_v59, 0.0 }
0x15db   :  { %1018 = vrot.lane.b32.xlu1 %v1005_v60, %s2684_s21 }
0x164d   :  { %v1019_v61 = vpop.permute.xlu1 %1018 }
0x164e   :  { %2463 = vmatmul.mubr.msk.f32.vlgmr.msra.gmra.mxu0 %vm198_vm2, %v1019_v61 }
0x164f   :  { %2478 = vmatprep.mubr.msk.f32.mxu0 %vm2682_vm1, %v2681_v3  ;;  %2471 = vmatpush3.msra.mxu0 %v2985_v25 }
0x1650   :  { %2472 = vmatprep.subr.mxu0 %v2681_v3 }
0x1651   :  { %2473 = vmatpush3.msra.mxu0 %v3003_v5 }
0x1652   :  { %2474 = vmatprep.subr.mxu0 %v2681_v3 }
0x1653   :  { %2475 = vmatpush3.msra.mxu0 %v3010_v7 }
0x1654   :  { %2476 = vmatprep.subr.mxu0 %v2681_v3 }
0x1655   :  { %2477 = vmatpush3.msra.mxu0 %v3020_v6 }
0x1656   :  { %2479 = vmatmul.mubr.f32.vlgmr.msra.gmra.mxu0 %v2681_v3  ;;  %2492 = vmatprep.subr.mxu0 %v2681_v3 }
0x1657   :  { %2500 = vmatprep.mubr.msk.f32.mxu0 %vm2682_vm1, %v2681_v3  ;;  %2493 = vmatpush3.msra.mxu0 %v2985_v25 }
0x1658   :  { %2494 = vmatprep.subr.mxu0 %v2681_v3 }
0x1659   :  { %2495 = vmatpush3.msra.mxu0 %v3003_v5 }
0x165a   :  { %2496 = vmatprep.subr.mxu0 %v2681_v3 }
0x165b   :  { %2497 = vmatpush3.msra.mxu0 %v3010_v7 }
0x165c   :  { %2498 = vmatprep.subr.mxu0 %v2681_v3 }
0x165d   :  { %2499 = vmatpush3.msra.mxu0 %v3020_v6 }
0x165e   :  { %2514 = vmatprep.subr.mxu0 %v2681_v3 }
0x170e   :  { %v1088_v63 = vpop.f32.mrf.mxu0 }
0x170f   :  { %v2992_v0 = vadd.f32 %v2208_v62, %v1088_v63 }
0x1710   :  { %v2464_v1 = vpop.f32.mrf.mxu0 }
0x1711   :  { %1092 = vst.msk [vmem:[%s3251_s13] sm:$0xff] %vm68_vm0, %v2992_v0  ;;  %v1099_v4 = vmul.f32 0.5, %v2992_v0 }
0x1713   :  { %v1100_v2 = vmul.f32 1.442695, %v1099_v4 }
0x1715   :  { %2631 = vpow2.f32 %v1100_v2 }
0x1716   :  { %v1255_v14 = vpop.f32.mrf.mxu0 }
0x1718   :  { %v2480_v15 = vpop.f32.mrf.mxu0 }
0x1722   :  { %v2632_v11 = vpop.eup %2631 }
0x1723   :  { %1103 = vrot.lane.b32.xlu0 %v2632_v11, %s2685_s7 }
0x1795   :  { %v1104_v9 = vpop.permute.xlu0 %1103 }
0x1796   :  { %v1106_v13 = vmul.f32 %v1104_v9, %v1098_v12 }
0x1798   :  { %v1107_v10 = vadd.f32 %v1106_v13, %v2992_v0 }
0x179a   :  { %2468 = vmatmul.mubr.msk.f32.vlgmr.msra.gmra.mxu1 %vm68_vm0, %v1107_v10 }
0x179b   :  { %2482 = vmatpush3.msra.mxu1 %v2985_v25  ;;  %2489 = vmatprep.mubr.msk.f32.mxu1 %vm2682_vm1, %v2681_v3 }
0x179c   :  { %2483 = vmatprep.subr.mxu1 %v2681_v3 }
0x179d   :  { %2484 = vmatpush3.msra.mxu1 %v3003_v5 }
0x179e   :  { %2485 = vmatprep.subr.mxu1 %v2681_v3 }
0x179f   :  { %2486 = vmatpush3.msra.mxu1 %v3010_v7 }
0x17a0   :  { %2487 = vmatprep.subr.mxu1 %v2681_v3 }
0x17a1   :  { %2488 = vmatpush3.msra.mxu1 %v3020_v6 }
0x17a2   :  { %2503 = vmatprep.subr.mxu1 %v2681_v3 }
0x185a   :  { %v1185_v16 = vpop.f32.mrf.mxu1 }
0x185b   :  { %v3055_v17 = vadd.f32 %v2210_v23, %v1185_v16 }
0x185c   :  { %v2469_v18 = vpop.f32.mrf.mxu1 }
0x185d   :  { %v1259_v20 = vadd.f32 %v1255_v14, %v3055_v17 }
0x185f   :  { %v2212_v22 = vmul.f32 -1.442695, %v1259_v20 }
0x1861   :  { %2633 = vpow2.f32 %v2212_v22 }
0x186e   :  { %v2634_v24 = vpop.eup %2633 }
0x186f   :  { %v1263_v21 = vadd.f32 1.0, %v2634_v24 }
0x1871   :  { %2635 = vrcp.f32 %v1263_v21 }
0x187e   :  { %v2636_v26 = vpop.eup %2635 }
0x187f   :  { %v1266_v28 = vmul.f32 2.0, %v2636_v26  ;;  %v1268_v33 = vmul.f32 0.0, %v2636_v26 }
0x1881   :  { %v2213_v29 = vadd.f32 -1.0, %v1266_v28 }
0x1883   :  { %1270 = vrot.lane.b32.xlu1 %v2213_v29, %s2683_s3 }
0x18f5   :  { %v1271_v31 = vpop.permute.xlu1 %1270 }
0x18f6   :  { %v1273_v32 = vmul.f32 %v2636_v26, %v1271_v31 }
0x18f8   :  { %1275 = vrot.lane.b32.xlu0 %v1273_v32, %s2683_s3 }
0x196a   :  { %v1276_v34 = vpop.permute.xlu0 %1275 }
0x196b   :  { %v1278_v35 = vadd.f32 %v1276_v34, %v1268_v33 }
0x196d   :  { %2637 = vtanh.f32 %v1278_v35 }
0x197a   :  { %v2638_v36 = vpop.eup %2637 }
0x197b   :  { %1281 = vrot.lane.b32.xlu1 %v2638_v36, %s2683_s3 }
0x19ed   :  { %v1282_v37 = vpop.permute.xlu1 %1281 }
0x19ee   :  { %v3061_v30 = vmul.f32 %v2636_v26, %v1282_v37 }
0x19f0   :  { %1286 = vrot.lane.b32.xlu0 %v3061_v30, %s2684_s21 }
0x1a62   :  { %v1287_v38 = vpop.permute.xlu0 %1286 }
0x1a63   :  { %2490 = vmatmul.mubr.msk.f32.vlgmr.msra.gmra.mxu1 %vm198_vm2, %v1287_v38 }
0x1a64   :  { %2504 = vmatpush3.msra.mxu1 %v2985_v25  ;;  %2511 = vmatprep.mubr.msk.f32.mxu1 %vm2682_vm1, %v2681_v3 }
0x1a65   :  { %2505 = vmatprep.subr.mxu1 %v2681_v3 }
0x1a66   :  { %2506 = vmatpush3.msra.mxu1 %v3003_v5 }
0x1a67   :  { %2507 = vmatprep.subr.mxu1 %v2681_v3 }
0x1a68   :  { %2508 = vmatpush3.msra.mxu1 %v3010_v7 }
0x1a69   :  { %2509 = vmatprep.subr.mxu1 %v2681_v3 }
0x1a6a   :  { %2510 = vmatpush3.msra.mxu1 %v3020_v6 }
0x1a6b   :  { %2525 = vmatprep.subr.mxu1 %v2681_v3 }
0x1b23   :  { %v1356_v39 = vpop.f32.mrf.mxu1 }
0x1b24   :  { %v1360_v40 = vadd.f32 %v1356_v39, %v3055_v17 }
0x1b25   :  { %v2491_v41 = vpop.f32.mrf.mxu1 }
0x1b26   :  { %v2215_v42 = vmul.f32 -1.442695, %v1360_v40 }
0x1b28   :  { %2639 = vpow2.f32 %v2215_v42 }
0x1b35   :  { %v2640_v43 = vpop.eup %2639 }
0x1b36   :  { %v1364_v44 = vadd.f32 1.0, %v2640_v43 }
0x1b38   :  { %2641 = vrcp.f32 %v1364_v44 }
0x1b45   :  { %v2642_v19 = vpop.eup %2641 }
0x1b46   :  { %v1367_v45 = vmul.f32 2.0, %v2642_v19  ;;  %v1369_v49 = vmul.f32 %v2642_v19, %v1278_v35 }
0x1b48   :  { %v2216_v46 = vadd.f32 -1.0, %v1367_v45 }
0x1b4a   :  { %1371 = vrot.lane.b32.xlu1 %v2216_v46, %s2683_s3 }
0x1bbc   :  { %v1372_v47 = vpop.permute.xlu1 %1371 }
0x1bbd   :  { %v1374_v48 = vmul.f32 %v2642_v19, %v1372_v47 }
0x1bbf   :  { %1376 = vrot.lane.b32.xlu0 %v1374_v48, %s2683_s3 }
0x1c31   :  { %v1377_v50 = vpop.permute.xlu0 %1376 }
0x1c32   :  { %v1379_v51 = vadd.f32 %v1377_v50, %v1369_v49 }
0x1c34   :  { %2643 = vtanh.f32 %v1379_v51 }
0x1c41   :  { %v2644_v52 = vpop.eup %2643 }
0x1c42   :  { %1382 = vrot.lane.b32.xlu1 %v2644_v52, %s2683_s3 }
0x1cb4   :  { %v1383_v53 = vpop.permute.xlu1 %1382 }
0x1cb5   :  { %v3080_v27 = vmul.f32 %v2642_v19, %v1383_v53 }
0x1cb7   :  { %1387 = vrot.lane.b32.xlu0 %v3080_v27, %s2684_s21 }
0x1d29   :  { %v1388_v54 = vpop.permute.xlu0 %1387 }
0x1d2a   :  { %2501 = vmatmul.mubr.msk.f32.vlgmr.msra.gmra.mxu0 %vm198_vm2, %v1388_v54 }
0x1d2b   :  { %2515 = vmatpush3.msra.mxu0 %v2985_v25  ;;  %2522 = vmatprep.mubr.msk.f32.mxu0 %vm2682_vm1, %v2681_v3 }
0x1d2c   :  { %2516 = vmatprep.subr.mxu0 %v2681_v3 }
0x1d2d   :  { %2517 = vmatpush3.msra.mxu0 %v3003_v5 }
0x1d2e   :  { %2518 = vmatprep.subr.mxu0 %v2681_v3 }
0x1d2f   :  { %2519 = vmatpush3.msra.mxu0 %v3010_v7 }
0x1d30   :  { %2520 = vmatprep.subr.mxu0 %v2681_v3 }
0x1d31   :  { %2521 = vmatpush3.msra.mxu0 %v3020_v6 }
0x1d32   :  { %2536 = vmatprep.subr.mxu0 %v2681_v3 }
0x1dea   :  { %v1457_v55 = vpop.f32.mrf.mxu0 }
0x1deb   :  { %v1461_v56 = vadd.f32 %v1457_v55, %v3055_v17 }
0x1dec   :  { %v2502_v57 = vpop.f32.mrf.mxu0 }
0x1ded   :  { %v2218_v58 = vmul.f32 -1.442695, %v1461_v56 }
0x1def   :  { %2645 = vpow2.f32 %v2218_v58 }
0x1dfc   :  { %v2646_v59 = vpop.eup %2645 }
0x1dfd   :  { %v1465_v60 = vadd.f32 1.0, %v2646_v59 }
0x1dff   :  { %2647 = vrcp.f32 %v1465_v60 }
0x1e0c   :  { %v2648_v61 = vpop.eup %2647 }
0x1e0d   :  { %v1468_v62 = vmul.f32 2.0, %v2648_v61  ;;  %v1470_v2 = vmul.f32 %v2648_v61, %v1379_v51 }
0x1e0f   :  { %v2219_v63 = vadd.f32 -1.0, %v1468_v62 }
0x1e11   :  { %1472 = vrot.lane.b32.xlu1 %v2219_v63, %s2683_s3 }
0x1e83   :  { %v1473_v1 = vpop.permute.xlu1 %1472 }
0x1e84   :  { %v1475_v4 = vmul.f32 %v2648_v61, %v1473_v1 }
0x1e86   :  { %1477 = vrot.lane.b32.xlu0 %v1475_v4, %s2683_s3 }
0x1ef8   :  { %v1478_v8 = vpop.permute.xlu0 %1477 }
0x1ef9   :  { %v1480_v11 = vadd.f32 %v1478_v8, %v1470_v2 }
0x1efb   :  { %2649 = vtanh.f32 %v1480_v11 }
0x1f08   :  { %v2650_v12 = vpop.eup %2649 }
0x1f09   :  { %1483 = vrot.lane.b32.xlu1 %v2650_v12, %s2683_s3 }
0x1f7b   :  { %v1484_v9 = vpop.permute.xlu1 %1483 }
0x1f7c   :  { %v3099_v13 = vmul.f32 %v2648_v61, %v1484_v9 }
0x1f7e   :  { %1488 = vrot.lane.b32.xlu0 %v3099_v13, %s2684_s21 }
0x1ff0   :  { %v1489_v10 = vpop.permute.xlu0 %1488 }
0x1ff1   :  { %2512 = vmatmul.mubr.msk.f32.vlgmr.msra.gmra.mxu1 %vm198_vm2, %v1489_v10 }
0x1ff2   :  { %2526 = vmatpush3.msra.mxu1 %v2985_v25  ;;  %2533 = vmatprep.mubr.msk.f32.mxu1 %vm2682_vm1, %v2681_v3 }
0x1ff3   :  { %2527 = vmatprep.subr.mxu1 %v2681_v3 }
0x1ff4   :  { %2528 = vmatpush3.msra.mxu1 %v3003_v5 }
0x1ff5   :  { %2529 = vmatprep.subr.mxu1 %v2681_v3 }
0x1ff6   :  { %2530 = vmatpush3.msra.mxu1 %v3010_v7 }
0x1ff7   :  { %2531 = vmatprep.subr.mxu1 %v2681_v3 }
0x1ff8   :  { %2532 = vmatpush3.msra.mxu1 %v3020_v6 }
0x1ff9   :  { %2547 = vmatprep.subr.mxu1 %v2681_v3 }
0x20b1   :  { %v1558_v14 = vpop.f32.mrf.mxu1 }
0x20b2   :  { %v1562_v15 = vadd.f32 %v1558_v14, %v3055_v17 }
0x20b3   :  { %v2513_v23 = vpop.f32.mrf.mxu1 }
0x20b4   :  { %v2221_v16 = vmul.f32 -1.442695, %v1562_v15 }
0x20b6   :  { %2651 = vpow2.f32 %v2221_v16 }
0x20c3   :  { %v2652_v18 = vpop.eup %2651 }
0x20c4   :  { %v1566_v20 = vadd.f32 1.0, %v2652_v18 }
0x20c6   :  { %2653 = vrcp.f32 %v1566_v20 }
0x20d3   :  { %v2654_v22 = vpop.eup %2653 }
0x20d4   :  { %v1569_v24 = vmul.f32 2.0, %v2654_v22  ;;  %v1571_v29 = vmul.f32 %v2654_v22, %v1480_v11 }
0x20d6   :  { %v2222_v21 = vadd.f32 -1.0, %v1569_v24 }
0x20d8   :  { %1573 = vrot.lane.b32.xlu1 %v2222_v21, %s2683_s3 }
0x214a   :  { %v1574_v26 = vpop.permute.xlu1 %1573 }
0x214b   :  { %v1576_v28 = vmul.f32 %v2654_v22, %v1574_v26 }
0x214d   :  { %1578 = vrot.lane.b32.xlu0 %v1576_v28, %s2683_s3 }
0x21bf   :  { %v1579_v31 = vpop.permute.xlu0 %1578 }
0x21c0   :  { %v1581_v32 = vadd.f32 %v1579_v31, %v1571_v29 }
0x21c2   :  { %2655 = vtanh.f32 %v1581_v32 }
0x21cf   :  { %v2656_v33 = vpop.eup %2655 }
0x21d0   :  { %1584 = vrot.lane.b32.xlu1 %v2656_v33, %s2683_s3 }
0x2242   :  { %v1585_v34 = vpop.permute.xlu1 %1584 }
0x2243   :  { %v3118_v35 = vmul.f32 %v2654_v22, %v1585_v34 }
0x2245   :  { %1589 = vrot.lane.b32.xlu0 %v3118_v35, %s2684_s21 }
0x22b7   :  { %v1590_v36 = vpop.permute.xlu0 %1589 }
0x22b8   :  { %2523 = vmatmul.mubr.msk.f32.vlgmr.msra.gmra.mxu0 %vm198_vm2, %v1590_v36 }
0x22b9   :  { %2537 = vmatpush3.msra.mxu0 %v2985_v25  ;;  %2544 = vmatprep.mubr.msk.f32.mxu0 %vm2682_vm1, %v2681_v3 }
0x22ba   :  { %2538 = vmatprep.subr.mxu0 %v2681_v3 }
0x22bb   :  { %2539 = vmatpush3.msra.mxu0 %v3003_v5 }
0x22bc   :  { %2540 = vmatprep.subr.mxu0 %v2681_v3 }
0x22bd   :  { %2541 = vmatpush3.msra.mxu0 %v3010_v7 }
0x22be   :  { %2542 = vmatprep.subr.mxu0 %v2681_v3 }
0x22bf   :  { %2543 = vmatpush3.msra.mxu0 %v3020_v6 }
0x2378   :  { %v1659_v37 = vpop.f32.mrf.mxu0 }
0x2379   :  { %v1663_v38 = vadd.f32 %v1659_v37, %v3055_v17 }
0x237a   :  { %v2524_v39 = vpop.f32.mrf.mxu0 }
0x237b   :  { %v2224_v40 = vmul.f32 -1.442695, %v1663_v38 }
0x237d   :  { %2657 = vpow2.f32 %v2224_v40 }
0x238a   :  { %v2658_v41 = vpop.eup %2657 }
0x238b   :  { %v1667_v42 = vadd.f32 1.0, %v2658_v41 }
0x238d   :  { %2659 = vrcp.f32 %v1667_v42 }
0x239a   :  { %v2660_v43 = vpop.eup %2659 }
0x239b   :  { %v1670_v44 = vmul.f32 2.0, %v2660_v43  ;;  %v1672_v47 = vmul.f32 %v2660_v43, %v1581_v32 }
0x239d   :  { %v2225_v19 = vadd.f32 -1.0, %v1670_v44  ;;  %v1992_v44 = vmax.f32 %v3061_v30, 0.0  ;;  %v2002_v30 = vld [vmem:[%s3255_s10 + $0x10] sm:$0xff] }
0x239f   :  { %1674 = vrot.lane.b32.xlu1 %v2225_v19, %s2683_s3 }
0x2411   :  { %v1675_v45 = vpop.permute.xlu1 %1674 }
0x2412   :  { %v1677_v46 = vmul.f32 %v2660_v43, %v1675_v45 }
0x2414   :  { %1679 = vrot.lane.b32.xlu0 %v1677_v46, %s2683_s3  ;;  %v2003_v46 = vld [vmem:[%s3255_s10 + $0x18] sm:$0xff] }
0x2415   :  { %2558 = vmatprep.subr.mxu0 %v2003_v46 }
0x2486   :  { %v1680_v48 = vpop.permute.xlu0 %1679 }
0x2487   :  { %v1682_v49 = vadd.f32 %v1680_v48, %v1672_v47 }
0x2489   :  { %2661 = vtanh.f32 %v1682_v49 }
0x2496   :  { %v2662_v50 = vpop.eup %2661 }
0x2497   :  { %1685 = vrot.lane.b32.xlu1 %v2662_v50, %s2683_s3 }
0x2509   :  { %v1686_v51 = vpop.permute.xlu1 %1685 }
0x250a   :  { %v3136_v52 = vmul.f32 %v2660_v43, %v1686_v51  ;;  %v2000_v51 = vld [vmem:[%s3255_s10] sm:$0xff] }
0x250c   :  { %1690 = vrot.lane.b32.xlu0 %v3136_v52, %s2684_s21  ;;  %v1996_v19 = vmax.f32 %v3136_v52, 0.0 }
0x257e   :  { %v1691_v53 = vpop.permute.xlu0 %1690 }
0x257f   :  { %2534 = vmatmul.mubr.msk.f32.vlgmr.msra.gmra.mxu1 %vm198_vm2, %v1691_v53 }
0x2580   :  { %2548 = vmatpush3.msra.mxu1 %v2985_v25  ;;  %2555 = vmatprep.mubr.msk.f32.mxu1 %vm2682_vm1, %v2681_v3 }
0x2581   :  { %2549 = vmatprep.subr.mxu1 %v2681_v3 }
0x2582   :  { %2550 = vmatpush3.msra.mxu1 %v3003_v5 }
0x2583   :  { %2551 = vmatprep.subr.mxu1 %v2681_v3 }
0x2584   :  { %2552 = vmatpush3.msra.mxu1 %v3010_v7 }
0x2585   :  { %2553 = vmatprep.subr.mxu1 %v2681_v3 }
0x2586   :  { %2554 = vmatpush3.msra.mxu1 %v3020_v6 }
0x263f   :  { %v1760_v54 = vpop.f32.mrf.mxu1 }
0x2640   :  { %v1764_v55 = vadd.f32 %v1760_v54, %v3055_v17 }
0x2641   :  { %v2535_v56 = vpop.f32.mrf.mxu1 }
0x2642   :  { %v2227_v25 = vmul.f32 -1.442695, %v1764_v55  ;;  %v1993_v55 = vmax.f32 %v3080_v27, 0.0 }
0x2644   :  { %2663 = vpow2.f32 %v2227_v25  ;;  %v1995_v25 = vmax.f32 %v3118_v35, 0.0 }
0x2651   :  { %v2664_v57 = vpop.eup %2663 }
0x2652   :  { %v1768_v58 = vadd.f32 1.0, %v2664_v57 }
0x2654   :  { %2665 = vrcp.f32 %v1768_v58 }
0x2661   :  { %v2666_v59 = vpop.eup %2665 }
0x2662   :  { %v1771_v60 = vmul.f32 2.0, %v2666_v59  ;;  %v1773_v3 = vmul.f32 %v2666_v59, %v1682_v49  ;;  %v2001_v49 = vld [vmem:[%s3255_s10 + $0x8] sm:$0xff] }
0x2664   :  { %v2228_v5 = vadd.f32 -1.0, %v1771_v60 }
0x2666   :  { %1775 = vrot.lane.b32.xlu1 %v2228_v5, %s2683_s3 }
0x26d8   :  { %v1776_v61 = vpop.permute.xlu1 %1775 }
0x26d9   :  { %v1778_v7 = vmul.f32 %v2666_v59, %v1776_v61 }
0x26db   :  { %1780 = vrot.lane.b32.xlu0 %v1778_v7, %s2683_s3  ;;  %v2235_v7 = vld [vmem:[%s3257_s11] ss:$0 sm:$0xff] }
0x274d   :  { %v1781_v6 = vpop.permute.xlu0 %1780 }
0x274e   :  { %v1783_v62 = vadd.f32 %v1781_v6, %v1773_v3 }
0x2750   :  { %2667 = vtanh.f32 %v1783_v62 }
0x275d   :  { %v2668_v63 = vpop.eup %2667 }
0x275e   :  { %1786 = vrot.lane.b32.xlu1 %v2668_v63, %s2683_s3 }
0x27d0   :  { %v1787_v1 = vpop.permute.xlu1 %1786 }
0x27d1   :  { %v3154_v4 = vmul.f32 %v2666_v59, %v1787_v1 }
0x27d3   :  { %1791 = vrot.lane.b32.xlu0 %v3154_v4, %s2684_s21  ;;  %v1997_v57 = vmax.f32 %v3154_v4, 0.0 }
0x2845   :  { %v1792_v2 = vpop.permute.xlu0 %1791 }
0x2846   :  { %2545 = vmatmul.mubr.msk.f32.vlgmr.msra.gmra.mxu0 %vm198_vm2, %v1792_v2 }
0x2847   :  { %2559 = vmatpush3.msra.mxu0 %v2003_v46 }
0x2848   :  { %2560 = vmatprep.subr.mxu0 %v2002_v30 }
0x2849   :  { %2561 = vmatpush3.msra.mxu0 %v2002_v30 }
0x284a   :  { %2562 = vmatprep.subr.mxu0 %v2001_v49 }
0x284b   :  { %2563 = vmatpush3.msra.mxu0 %v2001_v49 }
0x284c   :  { %2564 = vmatprep.subr.mxu0 %v2000_v51 }
0x284d   :  { %2565 = vmatpush3.msra.mxu0 %v2000_v51 }
0x2906   :  { %v1861_v8 = vpop.f32.mrf.mxu0 }
0x2907   :  { %v1865_v11 = vadd.f32 %v1861_v8, %v3055_v17 }
0x2908   :  { %v2546_v12 = vpop.f32.mrf.mxu0 }
0x2909   :  { %v2230_v9 = vmul.f32 -1.442695, %v1865_v11 }
0x290b   :  { %2669 = vpow2.f32 %v2230_v9 }
0x2918   :  { %v2670_v10 = vpop.eup %2669 }
0x2919   :  { %v1869_v14 = vadd.f32 1.0, %v2670_v10 }
0x291b   :  { %2671 = vrcp.f32 %v1869_v14 }
0x2928   :  { %v2672_v15 = vpop.eup %2671 }
0x2929   :  { %v1872_v23 = vmul.f32 2.0, %v2672_v15  ;;  %v1874_v22 = vmul.f32 %v2672_v15, %v1783_v62 }
0x292b   :  { %v2231_v16 = vadd.f32 -1.0, %v1872_v23 }
0x292d   :  { %1876 = vrot.lane.b32.xlu1 %v2231_v16, %s2683_s3 }
0x299f   :  { %v1877_v18 = vpop.permute.xlu1 %1876 }
0x29a0   :  { %v1879_v20 = vmul.f32 %v2672_v15, %v1877_v18 }
0x29a2   :  { %1881 = vrot.lane.b32.xlu0 %v1879_v20, %s2683_s3 }
0x2a14   :  { %v1882_v24 = vpop.permute.xlu0 %1881 }
0x2a15   :  { %v1884_v21 = vadd.f32 %v1882_v24, %v1874_v22 }
0x2a17   :  { %2673 = vtanh.f32 %v1884_v21 }
0x2a24   :  { %v2674_v26 = vpop.eup %2673 }
0x2a25   :  { %1887 = vrot.lane.b32.xlu1 %v2674_v26, %s2683_s3 }
0x2a97   :  { %v1888_v28 = vpop.permute.xlu1 %1887 }
0x2a98   :  { %v1890_v29 = vmul.f32 %v2672_v15, %v1888_v28 }
0x2a9a   :  { %1892 = vrot.lane.b32.xlu0 %v1890_v29, %s2684_s21  ;;  %v1998_v45 = vmax.f32 %v1890_v29, 0.0 }
0x2b0c   :  { %v1893_v31 = vpop.permute.xlu0 %1892 }
0x2b0d   :  { %2556 = vmatmul.mubr.msk.f32.vlgmr.msra.gmra.mxu1 %vm198_vm2, %v1893_v31 }
0x2bcd   :  { %v1962_v32 = vpop.f32.mrf.mxu1 }
0x2bce   :  { %v1966_v33 = vadd.f32 %v1962_v32, %v3055_v17  ;;  %v1994_v17 = vmax.f32 %v3099_v13, 0.0 }
0x2bcf   :  { %v2557_v34 = vpop.f32.mrf.mxu1 }
0x2bd0   :  { %v2233_v36 = vmul.f32 -1.442695, %v1966_v33 }
0x2bd2   :  { %2675 = vpow2.f32 %v2233_v36 }
0x2bdf   :  { %v2676_v37 = vpop.eup %2675 }
0x2be0   :  { %v1970_v38 = vadd.f32 1.0, %v2676_v37 }
0x2be2   :  { %2677 = vrcp.f32 %v1970_v38 }
0x2bef   :  { %v2678_v39 = vpop.eup %2677 }
0x2bf0   :  { %v1973_v40 = vmul.f32 2.0, %v2678_v39  ;;  %v1975_v13 = vmul.f32 %v2678_v39, %v1884_v21 }
0x2bf2   :  { %v2234_v41 = vadd.f32 -1.0, %v1973_v40 }
0x2bf4   :  { %1977 = vrot.lane.b32.xlu1 %v2234_v41, %s2683_s3 }
0x2c66   :  { %v1978_v42 = vpop.permute.xlu1 %1977 }
0x2c67   :  { %v1980_v43 = vmul.f32 %v2678_v39, %v1978_v42 }
0x2c69   :  { %1982 = vrot.lane.b32.xlu0 %v1980_v43, %s2683_s3 }
0x2c6d   :  { %2019 = vrot.lane.b32.xlu0 %v1992_v44, %s2684_s21 }
0x2c71   :  { %2023 = vrot.lane.b32.xlu0 %v1994_v17, %s2684_s21 }
0x2c75   :  { %2027 = vrot.lane.b32.xlu0 %v1996_v19, %s2684_s21 }
0x2c79   :  { %2031 = vrot.lane.b32.xlu0 %v1998_v45, %s2684_s21 }
0x2c7d   :  { %1094 = vrot.lane.b32.xlu0 %v2992_v0, %s2685_s7 }
0x2cdb   :  { %v1983_v47 = vpop.permute.xlu0 %1982 }
0x2cdc   :  { %v1985_v48 = vadd.f32 %v1983_v47, %v1975_v13 }
0x2cde   :  { %2679 = vtanh.f32 %v1985_v48 }
0x2cdf   :  { %v2020_v50 = vpop.permute.xlu0 %2019 }
0x2ce0   :  { %2566 = vmatprep.mubr.msk.f32.mxu0 %vm198_vm2, %v2020_v50 }
0x2ce3   :  { %v2024_v0 = vpop.permute.xlu0 %2023 }
0x2ce7   :  { %v2028_v52 = vpop.permute.xlu0 %2027 }
0x2ceb   :  { %v2680_v53 = vpop.eup %2679  ;;  %v2032_v54 = vpop.permute.xlu0 %2031 }
0x2cec   :  { %1988 = vrot.lane.b32.xlu1 %v2680_v53, %s2683_s3 }
0x2cef   :  { %v1095_v56 = vpop.permute.xlu0 %1094 }
0x2cf0   :  { %1097 = vst.msk [vmem:[%s3256_s14] sm:$0xff] %vm68_vm0, %v1095_v56  ;;  %2021 = vrot.lane.b32.xlu1 %v1993_v55, %s2684_s21 }
0x2cf4   :  { %2025 = vrot.lane.b32.xlu1 %v1995_v25, %s2684_s21 }
0x2cf8   :  { %2029 = vrot.lane.b32.xlu1 %v1997_v57, %s2684_s21 }
0x2d5e   :  { %v1989_v58 = vpop.permute.xlu1 %1988 }
0x2d5f   :  { %v1991_v59 = vmul.f32 %v2678_v39, %v1989_v58 }
0x2d61   :  { %v1999_v60 = vmax.f32 %v1991_v59, 0.0 }
0x2d62   :  { %v2022_v27 = vpop.permute.xlu1 %2021 }
0x2d63   :  { %2033 = vrot.lane.b32.xlu1 %v1999_v60, %s2684_s21  ;;  %2567 = vmatmul.mubr.msk.f32.vlgmr.msra.gmra.mxu0 %vm198_vm2, %v2022_v27 }
0x2d64   :  { %2569 = vmatprep.mubr.msk.f32.mxu0 %vm198_vm2, %v2024_v0 }
0x2d66   :  { %v2026_v5 = vpop.permute.xlu1 %2025 }
0x2d67   :  { %2570 = vmatmul.mubr.msk.f32.gmra.mxu0 %vm198_vm2, %v2026_v5 }
0x2d68   :  { %2572 = vmatprep.mubr.msk.f32.mxu0 %vm198_vm2, %v2028_v52 }
0x2d6a   :  { %v2030_v35 = vpop.permute.xlu1 %2029 }
0x2d6b   :  { %2573 = vmatmul.mubr.msk.f32.gmra.mxu0 %vm198_vm2, %v2030_v35 }
0x2d6c   :  { %2575 = vmatprep.mubr.msk.f32.mxu0 %vm198_vm2, %v2032_v54 }
0x2dd5   :  { %v2034_v61 = vpop.permute.xlu1 %2033 }
0x2dd6   :  { %2576 = vmatmul.mubr.msk.f32.gmra.mxu0 %vm198_vm2, %v2034_v61 }
0x2e23   :  { %v2568_v3 = vpop.f32.mrf.mxu0 }
0x2e24   :  { %v2123_v6 = vadd.f32 %v2568_v3, %v2235_v7 }
0x2e25   :  { %v2117_v62 = vpop.f32.mrf.mxu0 }
0x2e26   :  { %2157 = vst.msk [vmem:[%s3258_s12 + $0x8] sm:$0xff] %vm68_vm0, %v2123_v6  ;;  %v2118_v63 = vadd.f32 %v2235_v7, %v2117_v62 }
0x2e27   :  { %v2571_v1 = vpop.f32.mrf.mxu0 }
0x2e28   :  { %2156 = vst.msk [vmem:[%s3258_s12] sm:$0xff] %vm68_vm0, %v2118_v63  ;;  %v2133_v4 = vadd.f32 %v2571_v1, %v2235_v7 }
0x2e29   :  { %v2127_v2 = vpop.f32.mrf.mxu0 }
0x2e2a   :  { %2159 = vst.msk [vmem:[%s3258_s12 + $0x18] sm:$0xff] %vm68_vm0, %v2133_v4  ;;  %v2128_v8 = vadd.f32 %v2235_v7, %v2127_v2 }
0x2e2b   :  { %v2574_v11 = vpop.f32.mrf.mxu0 }
0x2e2c   :  { %2158 = vst.msk [vmem:[%s3258_s12 + $0x10] sm:$0xff] %vm68_vm0, %v2128_v8  ;;  %v2143_v12 = vadd.f32 %v2574_v11, %v2235_v7 }
0x2e2d   :  { %v2137_v9 = vpop.f32.mrf.mxu0 }
0x2e2e   :  { %2161 = vst.msk [vmem:[%s3258_s12 + $0x28] sm:$0xff] %vm68_vm0, %v2143_v12  ;;  %v2138_v10 = vadd.f32 %v2235_v7, %v2137_v9 }
0x2e30   :  { %2160 = vst.msk [vmem:[%s3258_s12 + $0x20] sm:$0xff] %vm68_vm0, %v2138_v10 }
0x2e96   :  { %v2577_v14 = vpop.f32.mrf.mxu0 }
0x2e97   :  { %v2153_v15 = vadd.f32 %v2577_v14, %v2235_v7 }
0x2e98   :  { %v2147_v23 = vpop.f32.mrf.mxu0 }
0x2e99   :  { %2163 = vst.msk [vmem:[%s3258_s12 + $0x38] sm:$0xff] %vm68_vm0, %v2153_v15  ;;  %v2148_v16 = vadd.f32 %v2235_v7, %v2147_v23 }
0x2e9b   :  { %2162 = vst.msk [vmem:[%s3258_s12 + $0x30] sm:$0xff] %vm68_vm0, %v2148_v16 }

</bundles_post_ra>
